<compile_context>
chip_gen: v7x
topology: tpu7x:2x2x1
jax: 0.10.0
libtpu: 0.0.40
codegen_flags: <defaults>
</compile_context>

<pallas_src>
import jax
import jax.numpy as jnp
from jax import lax
from jax.experimental import pallas as pl
from jax.experimental.pallas import tpu as pltpu

INFINITY = 1.0e15          # matches the PyTorch module's INFINITY constant
LN_EPS = 1e-12             # cfg.layer_norm_eps (BERT default)


def _round_up(x, m):
    return ((x + m - 1) // m) * m


def _choose_tq(S):
    """Largest query-tile size (multiple of 8, <=256) that divides S."""
    for t in (256, 128, 64, 32, 16, 8):
        if t <= S and S % t == 0:
            return t
    return S


def _make_kernel(S, D, H, W, TQ):
    bf16 = jnp.bfloat16
    f32 = jnp.float32

    def kernel(xkv_ref, bias_ref, cp_ref,
               wq_ref, bq_ref, wk_ref, bk_ref, wv_ref, bv_ref,
               wo_ref, bo_ref, g_ref, beta_ref,
               out_ref,
               k_scr, v_scr):
        qt = pl.program_id(1)

        # ---- K/V cache fill: once per batch (first q-tile), all heads ----
        @pl.when(qt == 0)
        def _():
            xkv = xkv_ref[0].astype(bf16)                               # (S, D)
            for h in range(H):
                k = jnp.dot(xkv, wk_ref[h],
                            preferred_element_type=f32) + bk_ref[h]    # (S, W)
                v = jnp.dot(xkv, wv_ref[h],
                            preferred_element_type=f32) + bv_ref[h]    # (S, W)
                k_scr[h] = k.T.astype(bf16)                            # (W, S)
                v_scr[h] = v.astype(bf16)                              # (S, W)

        # ---- query tile sliced from the resident full-sequence block ----
        q_start = pl.multiple_of(qt * TQ, TQ)
        xq = xkv_ref[0, pl.ds(q_start, TQ), :]                          # (TQ, D) f32
        xq_bf = xq.astype(bf16)

        bias = bias_ref[0]                                              # (1, S)
        cp = cp_ref[0].astype(f32)                                      # (TQ, S)

        # ---- per-head attention, heads statically unrolled in-body ----
        acc = jnp.zeros((TQ, D), f32)
        for h in range(H):
            # Q projection (1/sqrt(W) scale folded into wq/bq host-side)
            q = jnp.dot(xq_bf, wq_ref[h],
                        preferred_element_type=f32) + bq_ref[h]         # (TQ, W)
            # scores against transposed K cache + additive mask bias
            s = jnp.dot(q.astype(bf16), k_scr[h],
                        preferred_element_type=f32) + bias              # (TQ, S)
            # softmax in f32 with EUP reciprocal
            m = jnp.max(s, axis=-1, keepdims=True)
            e = jnp.exp(s - m)
            p = e * pl.reciprocal(jnp.sum(e, axis=-1, keepdims=True), approx=True)
            # TODO(synk): attention dropout omitted (eval-mode identity).
            p = p * cp                                                   # C_prior reweight
            ctx = jnp.dot(p.astype(bf16), v_scr[h],
                          preferred_element_type=f32)                    # (TQ, W)
            # output projection accumulated across heads in a local f32 value
            acc = acc + jnp.dot(ctx.astype(bf16), wo_ref[h],
                                preferred_element_type=f32)              # (TQ, D)

        # ---- bias + residual + LayerNorm (f32) ----
        # TODO(synk): hidden dropout omitted (eval-mode identity).
        y = acc + bo_ref[...] + xq
        mu = jnp.mean(y, axis=-1, keepdims=True)
        var = jnp.mean((y - mu) ** 2, axis=-1, keepdims=True)
        yn = (y - mu) * lax.rsqrt(var + LN_EPS)
        out_ref[0] = yn * g_ref[...] + beta_ref[...]

    return kernel


def bert_attention(x, attention_mask, c_prior, params, n_heads):
    B, S0, D = x.shape
    H = n_heads
    W = D // H
    assert W * H == D

    f32 = jnp.float32
    bf16 = jnp.bfloat16
    scale = 1.0 / (float(W) ** 0.5)

    # --- host-side padding of the sequence axis (keys get -INF mask, padded
    #     query rows are sliced off the output) ---
    S = _round_up(S0, 128) if S0 > 128 else _round_up(S0, 8)
    x = x.astype(f32)
    attention_mask = attention_mask.astype(f32)
    c_prior = c_prior.astype(f32)
    if S != S0:
        x = jnp.pad(x, ((0, 0), (0, S - S0), (0, 0)))
        attention_mask = jnp.pad(attention_mask, ((0, 0), (0, S - S0)))
        c_prior = jnp.pad(c_prior, ((0, 0), (0, S - S0), (0, S - S0)))

    TQ = _choose_tq(S)
    NQ = S // TQ

    # --- host-side repack: head-major bf16 weights, scale folded into Q proj ---
    wq_h = (params["wq"] * scale).reshape(D, H, W).transpose(1, 0, 2).astype(bf16)
    wk_h = params["wk"].reshape(D, H, W).transpose(1, 0, 2).astype(bf16)
    wv_h = params["wv"].reshape(D, H, W).transpose(1, 0, 2).astype(bf16)
    wo_h = params["wo"].reshape(H, W, D).astype(bf16)

    bq_h = (params["bq"] * scale).reshape(H, 1, W).astype(f32)
    bk_h = params["bk"].reshape(H, 1, W).astype(f32)
    bv_h = params["bv"].reshape(H, 1, W).astype(f32)
    bo = params["bo"].reshape(1, D).astype(f32)
    ln_g = params["ln_g"].reshape(1, D).astype(f32)
    ln_b = params["ln_b"].reshape(1, D).astype(f32)

    # Additive mask bias, computed once host-side.
    mask_bias = jnp.where(attention_mask == 0.0, -INFINITY, 0.0).astype(f32)[:, None, :]
    # C_prior streamed as bf16 (dominant HBM read at realistic S).
    c_prior_bf = c_prior.astype(bf16)

    # --- BlockSpecs ---
    x_kv_spec = pl.BlockSpec((1, S, D), lambda b, qt: (b, 0, 0))
    bias_spec = pl.BlockSpec((1, 1, S), lambda b, qt: (b, 0, 0))
    cp_spec = pl.BlockSpec((1, TQ, S), lambda b, qt: (b, qt, 0))
    # VMEM-resident parameters: full-array blocks, constant block index.
    wh_spec = pl.BlockSpec((H, D, W), lambda b, qt: (0, 0, 0))
    bh_spec = pl.BlockSpec((H, 1, W), lambda b, qt: (0, 0, 0))
    wo_spec = pl.BlockSpec((H, W, D), lambda b, qt: (0, 0, 0))
    vec_spec = pl.BlockSpec((1, D), lambda b, qt: (0, 0))
    out_spec = pl.BlockSpec((1, TQ, D), lambda b, qt: (b, qt, 0))

    kernel = _make_kernel(S, D, H, W, TQ)

    out = pl.pallas_call(
        kernel,
        out_shape=jax.ShapeDtypeStruct((B, S, D), f32),
        grid_spec=pltpu.PrefetchScalarGridSpec(
            num_scalar_prefetch=0,
            grid=(B, NQ),
            in_specs=[
                x_kv_spec, bias_spec, cp_spec,
                wh_spec, bh_spec,        # Wq, bq (pre-scaled)
                wh_spec, bh_spec,        # Wk, bk
                wh_spec, bh_spec,        # Wv, bv
                wo_spec, vec_spec,       # Wo, bo
                vec_spec, vec_spec,      # LN gamma, beta
            ],
            out_specs=out_spec,
            scratch_shapes=[
                pltpu.VMEM((H, W, S), bf16),    # K cache, transposed (lane-dense S)
                pltpu.VMEM((H, S, W), bf16),    # V cache
            ],
        ),
        compiler_params=pltpu.CompilerParams(
            # K/V scratch carries state across the qt axis -> must stay "arbitrary".
            dimension_semantics=("parallel", "arbitrary"),
            vmem_limit_bytes=48 * 1024 * 1024,
        ),
    )(x, mask_bias, c_prior_bf,
      wq_h, bq_h, wk_h, bk_h, wv_h, bv_h,
      wo_h, bo, ln_g, ln_b)

    return out[:, :S0, :]


def reference(x, attention_mask, c_prior, params, n_heads):
    """Pure-JAX f32 reference mirroring the PyTorch forward (eval mode)."""
    B, S, D = x.shape
    H = n_heads
    W = D // H
    q = x @ params["wq"] + params["bq"]
    k = x @ params["wk"] + params["bk"]
    v = x @ params["wv"] + params["bv"]
    q = q.reshape(B, S, H, W).transpose(0, 2, 1, 3)
    k = k.reshape(B, S, H, W).transpose(0, 2, 1, 3)
    v = v.reshape(B, S, H, W).transpose(0, 2, 1, 3)
    s = (q @ k.transpose(0, 1, 3, 2)) / jnp.sqrt(jnp.float32(W))
    s = jnp.where(attention_mask[:, None, None, :] == 0.0, -INFINITY, s)
    p = jax.nn.softmax(s, axis=-1)
    p = p * c_prior[:, None, :, :]
    ctx = (p @ v).transpose(0, 2, 1, 3).reshape(B, S, D)
    ho = ctx @ params["wo"] + params["bo"]
    y = ho + x
    mu = y.mean(-1, keepdims=True)
    var = ((y - mu) ** 2).mean(-1, keepdims=True)
    return (y - mu) / jnp.sqrt(var + LN_EPS) * params["ln_g"] + params["ln_b"]


if __name__ == "__main__":
    B, S, D, H = 2, 8, 32, 4

    key = jax.random.PRNGKey(0)
    ks = jax.random.split(key, 12)

    # Deterministic synthetic parameters (cfg.dim = 32, cfg.n_heads = 4).
    params = {
        "wq": 0.02 * jax.random.normal(ks[0], (D, D), jnp.float32),
        "bq": 0.02 * jax.random.normal(ks[1], (1, D), jnp.float32),
        "wk": 0.02 * jax.random.normal(ks[2], (D, D), jnp.float32),
        "bk": 0.02 * jax.random.normal(ks[3], (1, D), jnp.float32),
        "wv": 0.02 * jax.random.normal(ks[4], (D, D), jnp.float32),
        "bv": 0.02 * jax.random.normal(ks[5], (1, D), jnp.float32),
        "wo": 0.02 * jax.random.normal(ks[6], (D, D), jnp.float32),
        "bo": 0.02 * jax.random.normal(ks[7], (1, D), jnp.float32),
        "ln_g": jnp.ones((1, D), jnp.float32),
        "ln_b": jnp.zeros((1, D), jnp.float32),
    }

    x = jax.random.normal(ks[8], (B, S, D), jnp.float32)
    # mask out the last 2 positions of each sequence
    attention_mask = jnp.ones((B, S), jnp.float32).at[:, -2:].set(0.0)
    c_prior = jax.nn.softmax(jax.random.normal(ks[9], (B, S, S), jnp.float32), axis=-1)

    out = bert_attention(x, attention_mask, c_prior, params, H)
    out = jax.block_until_ready(out)

    ref = reference(x, attention_mask, c_prior, params, H)
    assert out.shape == (B, S, D)
    # Kernel uses bf16 MXU operands (f32 accumulation) + approx reciprocal, so
    # compare against the f32 reference with a bf16-appropriate tolerance.
    assert jnp.allclose(out, ref, atol=1e-2, rtol=1e-2), "kernel does not match reference"

    print("KERNEL_OK")
</pallas_src>

<mosaic_0001>
module attributes {stable_mosaic.version = 11 : i64} {
  func.func @kernel(%arg0: i32, %arg1: i32, %arg2: memref<1x8x32xf32, #tpu.memory_space<vmem>>, %arg3: memref<1x1x8xf32, #tpu.memory_space<vmem>>, %arg4: memref<1x8x8xbf16, #tpu.memory_space<vmem>>, %arg5: memref<4x32x8xbf16, #tpu.memory_space<vmem>>, %arg6: memref<4x1x8xf32, #tpu.memory_space<vmem>>, %arg7: memref<4x32x8xbf16, #tpu.memory_space<vmem>>, %arg8: memref<4x1x8xf32, #tpu.memory_space<vmem>>, %arg9: memref<4x32x8xbf16, #tpu.memory_space<vmem>>, %arg10: memref<4x1x8xf32, #tpu.memory_space<vmem>>, %arg11: memref<4x8x32xbf16, #tpu.memory_space<vmem>>, %arg12: memref<1x32xf32, #tpu.memory_space<vmem>>, %arg13: memref<1x32xf32, #tpu.memory_space<vmem>>, %arg14: memref<1x32xf32, #tpu.memory_space<vmem>>, %arg15: memref<1x8x32xf32, #tpu.memory_space<vmem>>, %arg16: memref<4x8x8xbf16, #tpu.memory_space<vmem>>, %arg17: memref<4x8x8xbf16, #tpu.memory_space<vmem>>) attributes {dimension_semantics = [#tpu.dimension_semantics<parallel>, #tpu.dimension_semantics<arbitrary>], iteration_bounds = array<i64: 2, 1>, scalar_prefetch = 0 : i64, scratch_operands = 2 : i64, tpu.core_type = #tpu.core_type<tc>, window_params = [{transform_indices = @transform_0, window_bounds = array<i64: 1, 8, 32>}, {transform_indices = @transform_1, window_bounds = array<i64: 1, 1, 8>}, {transform_indices = @transform_2, window_bounds = array<i64: 1, 8, 8>}, {pipeline_mode = #tpu.pipeline_mode<synchronous>, transform_indices = @transform_3, window_bounds = array<i64: 4, 32, 8>}, {pipeline_mode = #tpu.pipeline_mode<synchronous>, transform_indices = @transform_4, window_bounds = array<i64: 4, 1, 8>}, {pipeline_mode = #tpu.pipeline_mode<synchronous>, transform_indices = @transform_5, window_bounds = array<i64: 4, 32, 8>}, {pipeline_mode = #tpu.pipeline_mode<synchronous>, transform_indices = @transform_6, window_bounds = array<i64: 4, 1, 8>}, {pipeline_mode = #tpu.pipeline_mode<synchronous>, transform_indices = @transform_7, window_bounds = array<i64: 4, 32, 8>}, {pipeline_mode = #tpu.pipeline_mode<synchronous>, transform_indices = @transform_8, window_bounds = array<i64: 4, 1, 8>}, {pipeline_mode = #tpu.pipeline_mode<synchronous>, transform_indices = @transform_9, window_bounds = array<i64: 4, 8, 32>}, {pipeline_mode = #tpu.pipeline_mode<synchronous>, transform_indices = @transform_10, window_bounds = array<i64: 1, 32>}, {pipeline_mode = #tpu.pipeline_mode<synchronous>, transform_indices = @transform_11, window_bounds = array<i64: 1, 32>}, {pipeline_mode = #tpu.pipeline_mode<synchronous>, transform_indices = @transform_12, window_bounds = array<i64: 1, 32>}, {transform_indices = @transform_13, window_bounds = array<i64: 1, 8, 32>}]} {
    %c0_i32 = arith.constant 0 : i32
    %0 = arith.cmpi eq, %arg1, %c0_i32 : i32
    %1 = arith.extui %0 : i1 to i32
    %c0_i32_0 = arith.constant 0 : i32
    %2 = arith.cmpi ne, %1, %c0_i32_0 : i32
    scf.if %2 {
      %c0_103 = arith.constant 0 : index
      %c0_104 = arith.constant 0 : index
      %c0_105 = arith.constant 0 : index
      %178 = vector.load %arg2[%c0_103, %c0_104, %c0_105] : memref<1x8x32xf32, #tpu.memory_space<vmem>>, vector<1x8x32xf32>
      %179 = vector.shape_cast %178 : vector<1x8x32xf32> to vector<8x32xf32>
      %180 = arith.truncf %179 : vector<8x32xf32> to vector<8x32xbf16>
      %c0_106 = arith.constant 0 : index
      %c0_107 = arith.constant 0 : index
      %c0_108 = arith.constant 0 : index
      %181 = vector.load %arg7[%c0_106, %c0_107, %c0_108] : memref<4x32x8xbf16, #tpu.memory_space<vmem>>, vector<1x32x8xbf16>
      %182 = vector.shape_cast %181 : vector<1x32x8xbf16> to vector<32x8xbf16>
      %cst_109 = arith.constant dense<0.000000e+00> : vector<8x8xf32>
      %183 = tpu.matmul %180, %182, %cst_109 {dimension_numbers = #tpu.dot_dimension_numbers<[1], [0], [0], [1], [0, 0, 1, 1], [], []>} : vector<8x32xbf16>, vector<32x8xbf16>, vector<8x8xf32> -> vector<8x8xf32>
      %c0_110 = arith.constant 0 : index
      %c0_111 = arith.constant 0 : index
      %c0_112 = arith.constant 0 : index
      %184 = vector.load %arg8[%c0_110, %c0_111, %c0_112] : memref<4x1x8xf32, #tpu.memory_space<vmem>>, vector<1x1x8xf32>
      %185 = vector.shape_cast %184 : vector<1x1x8xf32> to vector<1x8xf32>
      %186 = vector.broadcast %185 : vector<1x8xf32> to vector<8x8xf32>
      %187 = arith.addf %183, %186 : vector<8x8xf32>
      %c0_113 = arith.constant 0 : index
      %c0_114 = arith.constant 0 : index
      %c0_115 = arith.constant 0 : index
      %188 = vector.load %arg9[%c0_113, %c0_114, %c0_115] : memref<4x32x8xbf16, #tpu.memory_space<vmem>>, vector<1x32x8xbf16>
      %189 = vector.shape_cast %188 : vector<1x32x8xbf16> to vector<32x8xbf16>
      %cst_116 = arith.constant dense<0.000000e+00> : vector<8x8xf32>
      %190 = tpu.matmul %180, %189, %cst_116 {dimension_numbers = #tpu.dot_dimension_numbers<[1], [0], [0], [1], [0, 0, 1, 1], [], []>} : vector<8x32xbf16>, vector<32x8xbf16>, vector<8x8xf32> -> vector<8x8xf32>
      %c0_117 = arith.constant 0 : index
      %c0_118 = arith.constant 0 : index
      %c0_119 = arith.constant 0 : index
      %191 = vector.load %arg10[%c0_117, %c0_118, %c0_119] : memref<4x1x8xf32, #tpu.memory_space<vmem>>, vector<1x1x8xf32>
      %192 = vector.shape_cast %191 : vector<1x1x8xf32> to vector<1x8xf32>
      %193 = vector.broadcast %192 : vector<1x8xf32> to vector<8x8xf32>
      %194 = arith.addf %190, %193 : vector<8x8xf32>
      %195 = tpu.transpose %187, [1, 0] : vector<8x8xf32> -> vector<8x8xf32>
      %196 = arith.truncf %195 : vector<8x8xf32> to vector<8x8xbf16>
      %c0_120 = arith.constant 0 : index
      %c0_121 = arith.constant 0 : index
      %c0_122 = arith.constant 0 : index
      %197 = vector.load %arg16[%c0_120, %c0_121, %c0_122] : memref<4x8x8xbf16, #tpu.memory_space<vmem>>, vector<1x8x8xbf16>
      %198 = vector.shape_cast %197 : vector<1x8x8xbf16> to vector<8x8xbf16>
      %199 = vector.shape_cast %196 : vector<8x8xbf16> to vector<1x8x8xbf16>
      tpu.vector_store %arg16[%c0_120, %c0_121, %c0_122], %199 {strides = array<i32>} : memref<4x8x8xbf16, #tpu.memory_space<vmem>>, vector<1x8x8xbf16>,
      %200 = arith.truncf %194 : vector<8x8xf32> to vector<8x8xbf16>
      %c0_123 = arith.constant 0 : index
      %c0_124 = arith.constant 0 : index
      %c0_125 = arith.constant 0 : index
      %201 = vector.load %arg17[%c0_123, %c0_124, %c0_125] : memref<4x8x8xbf16, #tpu.memory_space<vmem>>, vector<1x8x8xbf16>
      %202 = vector.shape_cast %201 : vector<1x8x8xbf16> to vector<8x8xbf16>
      %203 = vector.shape_cast %200 : vector<8x8xbf16> to vector<1x8x8xbf16>
      tpu.vector_store %arg17[%c0_123, %c0_124, %c0_125], %203 {strides = array<i32>} : memref<4x8x8xbf16, #tpu.memory_space<vmem>>, vector<1x8x8xbf16>,
      %c1_126 = arith.constant 1 : index
      %c0_127 = arith.constant 0 : index
      %c0_128 = arith.constant 0 : index
      %204 = vector.load %arg7[%c1_126, %c0_127, %c0_128] : memref<4x32x8xbf16, #tpu.memory_space<vmem>>, vector<1x32x8xbf16>
      %205 = vector.shape_cast %204 : vector<1x32x8xbf16> to vector<32x8xbf16>
      %cst_129 = arith.constant dense<0.000000e+00> : vector<8x8xf32>
      %206 = tpu.matmul %180, %205, %cst_129 {dimension_numbers = #tpu.dot_dimension_numbers<[1], [0], [0], [1], [0, 0, 1, 1], [], []>} : vector<8x32xbf16>, vector<32x8xbf16>, vector<8x8xf32> -> vector<8x8xf32>
      %c1_130 = arith.constant 1 : index
      %c0_131 = arith.constant 0 : index
      %c0_132 = arith.constant 0 : index
      %207 = vector.load %arg8[%c1_130, %c0_131, %c0_132] : memref<4x1x8xf32, #tpu.memory_space<vmem>>, vector<1x1x8xf32>
      %208 = vector.shape_cast %207 : vector<1x1x8xf32> to vector<1x8xf32>
      %209 = vector.broadcast %208 : vector<1x8xf32> to vector<8x8xf32>
      %210 = arith.addf %206, %209 : vector<8x8xf32>
      %c1_133 = arith.constant 1 : index
      %c0_134 = arith.constant 0 : index
      %c0_135 = arith.constant 0 : index
      %211 = vector.load %arg9[%c1_133, %c0_134, %c0_135] : memref<4x32x8xbf16, #tpu.memory_space<vmem>>, vector<1x32x8xbf16>
      %212 = vector.shape_cast %211 : vector<1x32x8xbf16> to vector<32x8xbf16>
      %cst_136 = arith.constant dense<0.000000e+00> : vector<8x8xf32>
      %213 = tpu.matmul %180, %212, %cst_136 {dimension_numbers = #tpu.dot_dimension_numbers<[1], [0], [0], [1], [0, 0, 1, 1], [], []>} : vector<8x32xbf16>, vector<32x8xbf16>, vector<8x8xf32> -> vector<8x8xf32>
      %c1_137 = arith.constant 1 : index
      %c0_138 = arith.constant 0 : index
      %c0_139 = arith.constant 0 : index
      %214 = vector.load %arg10[%c1_137, %c0_138, %c0_139] : memref<4x1x8xf32, #tpu.memory_space<vmem>>, vector<1x1x8xf32>
      %215 = vector.shape_cast %214 : vector<1x1x8xf32> to vector<1x8xf32>
      %216 = vector.broadcast %215 : vector<1x8xf32> to vector<8x8xf32>
      %217 = arith.addf %213, %216 : vector<8x8xf32>
      %218 = tpu.transpose %210, [1, 0] : vector<8x8xf32> -> vector<8x8xf32>
      %219 = arith.truncf %218 : vector<8x8xf32> to vector<8x8xbf16>
      %c1_140 = arith.constant 1 : index
      %c0_141 = arith.constant 0 : index
      %c0_142 = arith.constant 0 : index
      %220 = vector.load %arg16[%c1_140, %c0_141, %c0_142] : memref<4x8x8xbf16, #tpu.memory_space<vmem>>, vector<1x8x8xbf16>
      %221 = vector.shape_cast %220 : vector<1x8x8xbf16> to vector<8x8xbf16>
      %222 = vector.shape_cast %219 : vector<8x8xbf16> to vector<1x8x8xbf16>
      tpu.vector_store %arg16[%c1_140, %c0_141, %c0_142], %222 {strides = array<i32>} : memref<4x8x8xbf16, #tpu.memory_space<vmem>>, vector<1x8x8xbf16>,
      %223 = arith.truncf %217 : vector<8x8xf32> to vector<8x8xbf16>
      %c1_143 = arith.constant 1 : index
      %c0_144 = arith.constant 0 : index
      %c0_145 = arith.constant 0 : index
      %224 = vector.load %arg17[%c1_143, %c0_144, %c0_145] : memref<4x8x8xbf16, #tpu.memory_space<vmem>>, vector<1x8x8xbf16>
      %225 = vector.shape_cast %224 : vector<1x8x8xbf16> to vector<8x8xbf16>
      %226 = vector.shape_cast %223 : vector<8x8xbf16> to vector<1x8x8xbf16>
      tpu.vector_store %arg17[%c1_143, %c0_144, %c0_145], %226 {strides = array<i32>} : memref<4x8x8xbf16, #tpu.memory_space<vmem>>, vector<1x8x8xbf16>,
      %c2_146 = arith.constant 2 : index
      %c0_147 = arith.constant 0 : index
      %c0_148 = arith.constant 0 : index
      %227 = vector.load %arg7[%c2_146, %c0_147, %c0_148] : memref<4x32x8xbf16, #tpu.memory_space<vmem>>, vector<1x32x8xbf16>
      %228 = vector.shape_cast %227 : vector<1x32x8xbf16> to vector<32x8xbf16>
      %cst_149 = arith.constant dense<0.000000e+00> : vector<8x8xf32>
      %229 = tpu.matmul %180, %228, %cst_149 {dimension_numbers = #tpu.dot_dimension_numbers<[1], [0], [0], [1], [0, 0, 1, 1], [], []>} : vector<8x32xbf16>, vector<32x8xbf16>, vector<8x8xf32> -> vector<8x8xf32>
      %c2_150 = arith.constant 2 : index
      %c0_151 = arith.constant 0 : index
      %c0_152 = arith.constant 0 : index
      %230 = vector.load %arg8[%c2_150, %c0_151, %c0_152] : memref<4x1x8xf32, #tpu.memory_space<vmem>>, vector<1x1x8xf32>
      %231 = vector.shape_cast %230 : vector<1x1x8xf32> to vector<1x8xf32>
      %232 = vector.broadcast %231 : vector<1x8xf32> to vector<8x8xf32>
      %233 = arith.addf %229, %232 : vector<8x8xf32>
      %c2_153 = arith.constant 2 : index
      %c0_154 = arith.constant 0 : index
      %c0_155 = arith.constant 0 : index
      %234 = vector.load %arg9[%c2_153, %c0_154, %c0_155] : memref<4x32x8xbf16, #tpu.memory_space<vmem>>, vector<1x32x8xbf16>
      %235 = vector.shape_cast %234 : vector<1x32x8xbf16> to vector<32x8xbf16>
      %cst_156 = arith.constant dense<0.000000e+00> : vector<8x8xf32>
      %236 = tpu.matmul %180, %235, %cst_156 {dimension_numbers = #tpu.dot_dimension_numbers<[1], [0], [0], [1], [0, 0, 1, 1], [], []>} : vector<8x32xbf16>, vector<32x8xbf16>, vector<8x8xf32> -> vector<8x8xf32>
      %c2_157 = arith.constant 2 : index
      %c0_158 = arith.constant 0 : index
      %c0_159 = arith.constant 0 : index
      %237 = vector.load %arg10[%c2_157, %c0_158, %c0_159] : memref<4x1x8xf32, #tpu.memory_space<vmem>>, vector<1x1x8xf32>
      %238 = vector.shape_cast %237 : vector<1x1x8xf32> to vector<1x8xf32>
      %239 = vector.broadcast %238 : vector<1x8xf32> to vector<8x8xf32>
      %240 = arith.addf %236, %239 : vector<8x8xf32>
      %241 = tpu.transpose %233, [1, 0] : vector<8x8xf32> -> vector<8x8xf32>
      %242 = arith.truncf %241 : vector<8x8xf32> to vector<8x8xbf16>
      %c2_160 = arith.constant 2 : index
      %c0_161 = arith.constant 0 : index
      %c0_162 = arith.constant 0 : index
      %243 = vector.load %arg16[%c2_160, %c0_161, %c0_162] : memref<4x8x8xbf16, #tpu.memory_space<vmem>>, vector<1x8x8xbf16>
      %244 = vector.shape_cast %243 : vector<1x8x8xbf16> to vector<8x8xbf16>
      %245 = vector.shape_cast %242 : vector<8x8xbf16> to vector<1x8x8xbf16>
      tpu.vector_store %arg16[%c2_160, %c0_161, %c0_162], %245 {strides = array<i32>} : memref<4x8x8xbf16, #tpu.memory_space<vmem>>, vector<1x8x8xbf16>,
      %246 = arith.truncf %240 : vector<8x8xf32> to vector<8x8xbf16>
      %c2_163 = arith.constant 2 : index
      %c0_164 = arith.constant 0 : index
      %c0_165 = arith.constant 0 : index
      %247 = vector.load %arg17[%c2_163, %c0_164, %c0_165] : memref<4x8x8xbf16, #tpu.memory_space<vmem>>, vector<1x8x8xbf16>
      %248 = vector.shape_cast %247 : vector<1x8x8xbf16> to vector<8x8xbf16>
      %249 = vector.shape_cast %246 : vector<8x8xbf16> to vector<1x8x8xbf16>
      tpu.vector_store %arg17[%c2_163, %c0_164, %c0_165], %249 {strides = array<i32>} : memref<4x8x8xbf16, #tpu.memory_space<vmem>>, vector<1x8x8xbf16>,
      %c3_166 = arith.constant 3 : index
      %c0_167 = arith.constant 0 : index
      %c0_168 = arith.constant 0 : index
      %250 = vector.load %arg7[%c3_166, %c0_167, %c0_168] : memref<4x32x8xbf16, #tpu.memory_space<vmem>>, vector<1x32x8xbf16>
      %251 = vector.shape_cast %250 : vector<1x32x8xbf16> to vector<32x8xbf16>
      %cst_169 = arith.constant dense<0.000000e+00> : vector<8x8xf32>
      %252 = tpu.matmul %180, %251, %cst_169 {dimension_numbers = #tpu.dot_dimension_numbers<[1], [0], [0], [1], [0, 0, 1, 1], [], []>} : vector<8x32xbf16>, vector<32x8xbf16>, vector<8x8xf32> -> vector<8x8xf32>
      %c3_170 = arith.constant 3 : index
      %c0_171 = arith.constant 0 : index
      %c0_172 = arith.constant 0 : index
      %253 = vector.load %arg8[%c3_170, %c0_171, %c0_172] : memref<4x1x8xf32, #tpu.memory_space<vmem>>, vector<1x1x8xf32>
      %254 = vector.shape_cast %253 : vector<1x1x8xf32> to vector<1x8xf32>
      %255 = vector.broadcast %254 : vector<1x8xf32> to vector<8x8xf32>
      %256 = arith.addf %252, %255 : vector<8x8xf32>
      %c3_173 = arith.constant 3 : index
      %c0_174 = arith.constant 0 : index
      %c0_175 = arith.constant 0 : index
      %257 = vector.load %arg9[%c3_173, %c0_174, %c0_175] : memref<4x32x8xbf16, #tpu.memory_space<vmem>>, vector<1x32x8xbf16>
      %258 = vector.shape_cast %257 : vector<1x32x8xbf16> to vector<32x8xbf16>
      %cst_176 = arith.constant dense<0.000000e+00> : vector<8x8xf32>
      %259 = tpu.matmul %180, %258, %cst_176 {dimension_numbers = #tpu.dot_dimension_numbers<[1], [0], [0], [1], [0, 0, 1, 1], [], []>} : vector<8x32xbf16>, vector<32x8xbf16>, vector<8x8xf32> -> vector<8x8xf32>
      %c3_177 = arith.constant 3 : index
      %c0_178 = arith.constant 0 : index
      %c0_179 = arith.constant 0 : index
      %260 = vector.load %arg10[%c3_177, %c0_178, %c0_179] : memref<4x1x8xf32, #tpu.memory_space<vmem>>, vector<1x1x8xf32>
      %261 = vector.shape_cast %260 : vector<1x1x8xf32> to vector<1x8xf32>
      %262 = vector.broadcast %261 : vector<1x8xf32> to vector<8x8xf32>
      %263 = arith.addf %259, %262 : vector<8x8xf32>
      %264 = tpu.transpose %256, [1, 0] : vector<8x8xf32> -> vector<8x8xf32>
      %265 = arith.truncf %264 : vector<8x8xf32> to vector<8x8xbf16>
      %c3_180 = arith.constant 3 : index
      %c0_181 = arith.constant 0 : index
      %c0_182 = arith.constant 0 : index
      %266 = vector.load %arg16[%c3_180, %c0_181, %c0_182] : memref<4x8x8xbf16, #tpu.memory_space<vmem>>, vector<1x8x8xbf16>
      %267 = vector.shape_cast %266 : vector<1x8x8xbf16> to vector<8x8xbf16>
      %268 = vector.shape_cast %265 : vector<8x8xbf16> to vector<1x8x8xbf16>
      tpu.vector_store %arg16[%c3_180, %c0_181, %c0_182], %268 {strides = array<i32>} : memref<4x8x8xbf16, #tpu.memory_space<vmem>>, vector<1x8x8xbf16>,
      %269 = arith.truncf %263 : vector<8x8xf32> to vector<8x8xbf16>
      %c3_183 = arith.constant 3 : index
      %c0_184 = arith.constant 0 : index
      %c0_185 = arith.constant 0 : index
      %270 = vector.load %arg17[%c3_183, %c0_184, %c0_185] : memref<4x8x8xbf16, #tpu.memory_space<vmem>>, vector<1x8x8xbf16>
      %271 = vector.shape_cast %270 : vector<1x8x8xbf16> to vector<8x8xbf16>
      %272 = vector.shape_cast %269 : vector<8x8xbf16> to vector<1x8x8xbf16>
      tpu.vector_store %arg17[%c3_183, %c0_184, %c0_185], %272 {strides = array<i32>} : memref<4x8x8xbf16, #tpu.memory_space<vmem>>, vector<1x8x8xbf16>,
    } else {
    }
    %c8_i32 = arith.constant 8 : i32
    %3 = arith.muli %arg1, %c8_i32 : i32
    %4 = tpu.assume_multiple %3, 8 : i32
    %c0 = arith.constant 0 : index
    %5 = arith.index_cast %4 : i32 to index
    %c0_1 = arith.constant 0 : index
    %6 = vector.load %arg2[%c0, %5, %c0_1] : memref<1x8x32xf32, #tpu.memory_space<vmem>>, vector<1x8x32xf32>
    %7 = vector.shape_cast %6 : vector<1x8x32xf32> to vector<8x32xf32>
    %8 = arith.truncf %7 : vector<8x32xf32> to vector<8x32xbf16>
    %c0_2 = arith.constant 0 : index
    %c0_3 = arith.constant 0 : index
    %c0_4 = arith.constant 0 : index
    %9 = vector.load %arg3[%c0_2, %c0_3, %c0_4] : memref<1x1x8xf32, #tpu.memory_space<vmem>>, vector<1x1x8xf32>
    %10 = vector.shape_cast %9 : vector<1x1x8xf32> to vector<1x8xf32>
    %c0_5 = arith.constant 0 : index
    %c0_6 = arith.constant 0 : index
    %c0_7 = arith.constant 0 : index
    %11 = vector.load %arg4[%c0_5, %c0_6, %c0_7] : memref<1x8x8xbf16, #tpu.memory_space<vmem>>, vector<1x8x8xbf16>
    %12 = vector.shape_cast %11 : vector<1x8x8xbf16> to vector<8x8xbf16>
    %13 = arith.extf %12 : vector<8x8xbf16> to vector<8x8xf32>
    %cst = arith.constant 0.000000e+00 : f32
    %14 = vector.broadcast %cst : f32 to vector<8x32xf32>
    %c0_8 = arith.constant 0 : index
    %c0_9 = arith.constant 0 : index
    %c0_10 = arith.constant 0 : index
    %15 = vector.load %arg5[%c0_8, %c0_9, %c0_10] : memref<4x32x8xbf16, #tpu.memory_space<vmem>>, vector<1x32x8xbf16>
    %16 = vector.shape_cast %15 : vector<1x32x8xbf16> to vector<32x8xbf16>
    %cst_11 = arith.constant dense<0.000000e+00> : vector<8x8xf32>
    %17 = tpu.matmul %8, %16, %cst_11 {dimension_numbers = #tpu.dot_dimension_numbers<[1], [0], [0], [1], [0, 0, 1, 1], [], []>} : vector<8x32xbf16>, vector<32x8xbf16>, vector<8x8xf32> -> vector<8x8xf32>
    %c0_12 = arith.constant 0 : index
    %c0_13 = arith.constant 0 : index
    %c0_14 = arith.constant 0 : index
    %18 = vector.load %arg6[%c0_12, %c0_13, %c0_14] : memref<4x1x8xf32, #tpu.memory_space<vmem>>, vector<1x1x8xf32>
    %19 = vector.shape_cast %18 : vector<1x1x8xf32> to vector<1x8xf32>
    %20 = vector.broadcast %19 : vector<1x8xf32> to vector<8x8xf32>
    %21 = arith.addf %17, %20 : vector<8x8xf32>
    %22 = arith.truncf %21 : vector<8x8xf32> to vector<8x8xbf16>
    %c0_15 = arith.constant 0 : index
    %c0_16 = arith.constant 0 : index
    %c0_17 = arith.constant 0 : index
    %23 = vector.load %arg16[%c0_15, %c0_16, %c0_17] : memref<4x8x8xbf16, #tpu.memory_space<vmem>>, vector<1x8x8xbf16>
    %24 = vector.shape_cast %23 : vector<1x8x8xbf16> to vector<8x8xbf16>
    %cst_18 = arith.constant dense<0.000000e+00> : vector<8x8xf32>
    %25 = tpu.matmul %22, %24, %cst_18 {dimension_numbers = #tpu.dot_dimension_numbers<[1], [0], [0], [1], [0, 0, 1, 1], [], []>} : vector<8x8xbf16>, vector<8x8xbf16>, vector<8x8xf32> -> vector<8x8xf32>
    %26 = vector.broadcast %10 : vector<1x8xf32> to vector<8x8xf32>
    %27 = arith.addf %25, %26 : vector<8x8xf32>
    %cst_19 = arith.constant dense<0xFF800000> : vector<8xf32>
    %28 = vector.multi_reduction <maximumf>, %27, %cst_19 [1] : vector<8x8xf32> to vector<8xf32>
    %29 = vector.shape_cast %28 : vector<8xf32> to vector<8x1xf32>
    %30 = vector.broadcast %29 : vector<8x1xf32> to vector<8x8xf32>
    %31 = arith.subf %27, %30 : vector<8x8xf32>
    %32 = math.exp %31 : vector<8x8xf32>
    %cst_20 = arith.constant dense<0.000000e+00> : vector<8xf32>
    %33 = vector.multi_reduction <add>, %32, %cst_20 [1] : vector<8x8xf32> to vector<8xf32>
    %34 = vector.shape_cast %33 : vector<8xf32> to vector<8x1xf32>
    %35 = tpu.reciprocal %34 {approx = true} : vector<8x1xf32> -> vector<8x1xf32>
    %36 = vector.broadcast %35 : vector<8x1xf32> to vector<8x8xf32>
    %37 = arith.mulf %32, %36 : vector<8x8xf32>
    %38 = arith.mulf %37, %13 : vector<8x8xf32>
    %39 = arith.truncf %38 : vector<8x8xf32> to vector<8x8xbf16>
    %c0_21 = arith.constant 0 : index
    %c0_22 = arith.constant 0 : index
    %c0_23 = arith.constant 0 : index
    %40 = vector.load %arg17[%c0_21, %c0_22, %c0_23] : memref<4x8x8xbf16, #tpu.memory_space<vmem>>, vector<1x8x8xbf16>
    %41 = vector.shape_cast %40 : vector<1x8x8xbf16> to vector<8x8xbf16>
    %cst_24 = arith.constant dense<0.000000e+00> : vector<8x8xf32>
    %42 = tpu.matmul %39, %41, %cst_24 {dimension_numbers = #tpu.dot_dimension_numbers<[1], [0], [0], [1], [0, 0, 1, 1], [], []>} : vector<8x8xbf16>, vector<8x8xbf16>, vector<8x8xf32> -> vector<8x8xf32>
    %43 = arith.truncf %42 : vector<8x8xf32> to vector<8x8xbf16>
    %c0_25 = arith.constant 0 : index
    %c0_26 = arith.constant 0 : index
    %c0_27 = arith.constant 0 : index
    %44 = vector.load %arg11[%c0_25, %c0_26, %c0_27] : memref<4x8x32xbf16, #tpu.memory_space<vmem>>, vector<1x8x32xbf16>
    %45 = vector.shape_cast %44 : vector<1x8x32xbf16> to vector<8x32xbf16>
    %cst_28 = arith.constant dense<0.000000e+00> : vector<8x32xf32>
    %46 = tpu.matmul %43, %45, %cst_28 {dimension_numbers = #tpu.dot_dimension_numbers<[1], [0], [0], [1], [0, 0, 1, 1], [], []>} : vector<8x8xbf16>, vector<8x32xbf16>, vector<8x32xf32> -> vector<8x32xf32>
    %47 = arith.addf %14, %46 : vector<8x32xf32>
    %c1 = arith.constant 1 : index
    %c0_29 = arith.constant 0 : index
    %c0_30 = arith.constant 0 : index
    %48 = vector.load %arg5[%c1, %c0_29, %c0_30] : memref<4x32x8xbf16, #tpu.memory_space<vmem>>, vector<1x32x8xbf16>
    %49 = vector.shape_cast %48 : vector<1x32x8xbf16> to vector<32x8xbf16>
    %cst_31 = arith.constant dense<0.000000e+00> : vector<8x8xf32>
    %50 = tpu.matmul %8, %49, %cst_31 {dimension_numbers = #tpu.dot_dimension_numbers<[1], [0], [0], [1], [0, 0, 1, 1], [], []>} : vector<8x32xbf16>, vector<32x8xbf16>, vector<8x8xf32> -> vector<8x8xf32>
    %c1_32 = arith.constant 1 : index
    %c0_33 = arith.constant 0 : index
    %c0_34 = arith.constant 0 : index
    %51 = vector.load %arg6[%c1_32, %c0_33, %c0_34] : memref<4x1x8xf32, #tpu.memory_space<vmem>>, vector<1x1x8xf32>
    %52 = vector.shape_cast %51 : vector<1x1x8xf32> to vector<1x8xf32>
    %53 = vector.broadcast %52 : vector<1x8xf32> to vector<8x8xf32>
    %54 = arith.addf %50, %53 : vector<8x8xf32>
    %55 = arith.truncf %54 : vector<8x8xf32> to vector<8x8xbf16>
    %c1_35 = arith.constant 1 : index
    %c0_36 = arith.constant 0 : index
    %c0_37 = arith.constant 0 : index
    %56 = vector.load %arg16[%c1_35, %c0_36, %c0_37] : memref<4x8x8xbf16, #tpu.memory_space<vmem>>, vector<1x8x8xbf16>
    %57 = vector.shape_cast %56 : vector<1x8x8xbf16> to vector<8x8xbf16>
    %cst_38 = arith.constant dense<0.000000e+00> : vector<8x8xf32>
    %58 = tpu.matmul %55, %57, %cst_38 {dimension_numbers = #tpu.dot_dimension_numbers<[1], [0], [0], [1], [0, 0, 1, 1], [], []>} : vector<8x8xbf16>, vector<8x8xbf16>, vector<8x8xf32> -> vector<8x8xf32>
    %59 = vector.broadcast %10 : vector<1x8xf32> to vector<8x8xf32>
    %60 = arith.addf %58, %59 : vector<8x8xf32>
    %cst_39 = arith.constant dense<0xFF800000> : vector<8xf32>
    %61 = vector.multi_reduction <maximumf>, %60, %cst_39 [1] : vector<8x8xf32> to vector<8xf32>
    %62 = vector.shape_cast %61 : vector<8xf32> to vector<8x1xf32>
    %63 = vector.broadcast %62 : vector<8x1xf32> to vector<8x8xf32>
    %64 = arith.subf %60, %63 : vector<8x8xf32>
    %65 = math.exp %64 : vector<8x8xf32>
    %cst_40 = arith.constant dense<0.000000e+00> : vector<8xf32>
    %66 = vector.multi_reduction <add>, %65, %cst_40 [1] : vector<8x8xf32> to vector<8xf32>
    %67 = vector.shape_cast %66 : vector<8xf32> to vector<8x1xf32>
    %68 = tpu.reciprocal %67 {approx = true} : vector<8x1xf32> -> vector<8x1xf32>
    %69 = vector.broadcast %68 : vector<8x1xf32> to vector<8x8xf32>
    %70 = arith.mulf %65, %69 : vector<8x8xf32>
    %71 = arith.mulf %70, %13 : vector<8x8xf32>
    %72 = arith.truncf %71 : vector<8x8xf32> to vector<8x8xbf16>
    %c1_41 = arith.constant 1 : index
    %c0_42 = arith.constant 0 : index
    %c0_43 = arith.constant 0 : index
    %73 = vector.load %arg17[%c1_41, %c0_42, %c0_43] : memref<4x8x8xbf16, #tpu.memory_space<vmem>>, vector<1x8x8xbf16>
    %74 = vector.shape_cast %73 : vector<1x8x8xbf16> to vector<8x8xbf16>
    %cst_44 = arith.constant dense<0.000000e+00> : vector<8x8xf32>
    %75 = tpu.matmul %72, %74, %cst_44 {dimension_numbers = #tpu.dot_dimension_numbers<[1], [0], [0], [1], [0, 0, 1, 1], [], []>} : vector<8x8xbf16>, vector<8x8xbf16>, vector<8x8xf32> -> vector<8x8xf32>
    %76 = arith.truncf %75 : vector<8x8xf32> to vector<8x8xbf16>
    %c1_45 = arith.constant 1 : index
    %c0_46 = arith.constant 0 : index
    %c0_47 = arith.constant 0 : index
    %77 = vector.load %arg11[%c1_45, %c0_46, %c0_47] : memref<4x8x32xbf16, #tpu.memory_space<vmem>>, vector<1x8x32xbf16>
    %78 = vector.shape_cast %77 : vector<1x8x32xbf16> to vector<8x32xbf16>
    %cst_48 = arith.constant dense<0.000000e+00> : vector<8x32xf32>
    %79 = tpu.matmul %76, %78, %cst_48 {dimension_numbers = #tpu.dot_dimension_numbers<[1], [0], [0], [1], [0, 0, 1, 1], [], []>} : vector<8x8xbf16>, vector<8x32xbf16>, vector<8x32xf32> -> vector<8x32xf32>
    %80 = arith.addf %47, %79 : vector<8x32xf32>
    %c2 = arith.constant 2 : index
    %c0_49 = arith.constant 0 : index
    %c0_50 = arith.constant 0 : index
    %81 = vector.load %arg5[%c2, %c0_49, %c0_50] : memref<4x32x8xbf16, #tpu.memory_space<vmem>>, vector<1x32x8xbf16>
    %82 = vector.shape_cast %81 : vector<1x32x8xbf16> to vector<32x8xbf16>
    %cst_51 = arith.constant dense<0.000000e+00> : vector<8x8xf32>
    %83 = tpu.matmul %8, %82, %cst_51 {dimension_numbers = #tpu.dot_dimension_numbers<[1], [0], [0], [1], [0, 0, 1, 1], [], []>} : vector<8x32xbf16>, vector<32x8xbf16>, vector<8x8xf32> -> vector<8x8xf32>
    %c2_52 = arith.constant 2 : index
    %c0_53 = arith.constant 0 : index
    %c0_54 = arith.constant 0 : index
    %84 = vector.load %arg6[%c2_52, %c0_53, %c0_54] : memref<4x1x8xf32, #tpu.memory_space<vmem>>, vector<1x1x8xf32>
    %85 = vector.shape_cast %84 : vector<1x1x8xf32> to vector<1x8xf32>
    %86 = vector.broadcast %85 : vector<1x8xf32> to vector<8x8xf32>
    %87 = arith.addf %83, %86 : vector<8x8xf32>
    %88 = arith.truncf %87 : vector<8x8xf32> to vector<8x8xbf16>
    %c2_55 = arith.constant 2 : index
    %c0_56 = arith.constant 0 : index
    %c0_57 = arith.constant 0 : index
    %89 = vector.load %arg16[%c2_55, %c0_56, %c0_57] : memref<4x8x8xbf16, #tpu.memory_space<vmem>>, vector<1x8x8xbf16>
    %90 = vector.shape_cast %89 : vector<1x8x8xbf16> to vector<8x8xbf16>
    %cst_58 = arith.constant dense<0.000000e+00> : vector<8x8xf32>
    %91 = tpu.matmul %88, %90, %cst_58 {dimension_numbers = #tpu.dot_dimension_numbers<[1], [0], [0], [1], [0, 0, 1, 1], [], []>} : vector<8x8xbf16>, vector<8x8xbf16>, vector<8x8xf32> -> vector<8x8xf32>
    %92 = vector.broadcast %10 : vector<1x8xf32> to vector<8x8xf32>
    %93 = arith.addf %91, %92 : vector<8x8xf32>
    %cst_59 = arith.constant dense<0xFF800000> : vector<8xf32>
    %94 = vector.multi_reduction <maximumf>, %93, %cst_59 [1] : vector<8x8xf32> to vector<8xf32>
    %95 = vector.shape_cast %94 : vector<8xf32> to vector<8x1xf32>
    %96 = vector.broadcast %95 : vector<8x1xf32> to vector<8x8xf32>
    %97 = arith.subf %93, %96 : vector<8x8xf32>
    %98 = math.exp %97 : vector<8x8xf32>
    %cst_60 = arith.constant dense<0.000000e+00> : vector<8xf32>
    %99 = vector.multi_reduction <add>, %98, %cst_60 [1] : vector<8x8xf32> to vector<8xf32>
    %100 = vector.shape_cast %99 : vector<8xf32> to vector<8x1xf32>
    %101 = tpu.reciprocal %100 {approx = true} : vector<8x1xf32> -> vector<8x1xf32>
    %102 = vector.broadcast %101 : vector<8x1xf32> to vector<8x8xf32>
    %103 = arith.mulf %98, %102 : vector<8x8xf32>
    %104 = arith.mulf %103, %13 : vector<8x8xf32>
    %105 = arith.truncf %104 : vector<8x8xf32> to vector<8x8xbf16>
    %c2_61 = arith.constant 2 : index
    %c0_62 = arith.constant 0 : index
    %c0_63 = arith.constant 0 : index
    %106 = vector.load %arg17[%c2_61, %c0_62, %c0_63] : memref<4x8x8xbf16, #tpu.memory_space<vmem>>, vector<1x8x8xbf16>
    %107 = vector.shape_cast %106 : vector<1x8x8xbf16> to vector<8x8xbf16>
    %cst_64 = arith.constant dense<0.000000e+00> : vector<8x8xf32>
    %108 = tpu.matmul %105, %107, %cst_64 {dimension_numbers = #tpu.dot_dimension_numbers<[1], [0], [0], [1], [0, 0, 1, 1], [], []>} : vector<8x8xbf16>, vector<8x8xbf16>, vector<8x8xf32> -> vector<8x8xf32>
    %109 = arith.truncf %108 : vector<8x8xf32> to vector<8x8xbf16>
    %c2_65 = arith.constant 2 : index
    %c0_66 = arith.constant 0 : index
    %c0_67 = arith.constant 0 : index
    %110 = vector.load %arg11[%c2_65, %c0_66, %c0_67] : memref<4x8x32xbf16, #tpu.memory_space<vmem>>, vector<1x8x32xbf16>
    %111 = vector.shape_cast %110 : vector<1x8x32xbf16> to vector<8x32xbf16>
    %cst_68 = arith.constant dense<0.000000e+00> : vector<8x32xf32>
    %112 = tpu.matmul %109, %111, %cst_68 {dimension_numbers = #tpu.dot_dimension_numbers<[1], [0], [0], [1], [0, 0, 1, 1], [], []>} : vector<8x8xbf16>, vector<8x32xbf16>, vector<8x32xf32> -> vector<8x32xf32>
    %113 = arith.addf %80, %112 : vector<8x32xf32>
    %c3 = arith.constant 3 : index
    %c0_69 = arith.constant 0 : index
    %c0_70 = arith.constant 0 : index
    %114 = vector.load %arg5[%c3, %c0_69, %c0_70] : memref<4x32x8xbf16, #tpu.memory_space<vmem>>, vector<1x32x8xbf16>
    %115 = vector.shape_cast %114 : vector<1x32x8xbf16> to vector<32x8xbf16>
    %cst_71 = arith.constant dense<0.000000e+00> : vector<8x8xf32>
    %116 = tpu.matmul %8, %115, %cst_71 {dimension_numbers = #tpu.dot_dimension_numbers<[1], [0], [0], [1], [0, 0, 1, 1], [], []>} : vector<8x32xbf16>, vector<32x8xbf16>, vector<8x8xf32> -> vector<8x8xf32>
    %c3_72 = arith.constant 3 : index
    %c0_73 = arith.constant 0 : index
    %c0_74 = arith.constant 0 : index
    %117 = vector.load %arg6[%c3_72, %c0_73, %c0_74] : memref<4x1x8xf32, #tpu.memory_space<vmem>>, vector<1x1x8xf32>
    %118 = vector.shape_cast %117 : vector<1x1x8xf32> to vector<1x8xf32>
    %119 = vector.broadcast %118 : vector<1x8xf32> to vector<8x8xf32>
    %120 = arith.addf %116, %119 : vector<8x8xf32>
    %121 = arith.truncf %120 : vector<8x8xf32> to vector<8x8xbf16>
    %c3_75 = arith.constant 3 : index
    %c0_76 = arith.constant 0 : index
    %c0_77 = arith.constant 0 : index
    %122 = vector.load %arg16[%c3_75, %c0_76, %c0_77] : memref<4x8x8xbf16, #tpu.memory_space<vmem>>, vector<1x8x8xbf16>
    %123 = vector.shape_cast %122 : vector<1x8x8xbf16> to vector<8x8xbf16>
    %cst_78 = arith.constant dense<0.000000e+00> : vector<8x8xf32>
    %124 = tpu.matmul %121, %123, %cst_78 {dimension_numbers = #tpu.dot_dimension_numbers<[1], [0], [0], [1], [0, 0, 1, 1], [], []>} : vector<8x8xbf16>, vector<8x8xbf16>, vector<8x8xf32> -> vector<8x8xf32>
    %125 = vector.broadcast %10 : vector<1x8xf32> to vector<8x8xf32>
    %126 = arith.addf %124, %125 : vector<8x8xf32>
    %cst_79 = arith.constant dense<0xFF800000> : vector<8xf32>
    %127 = vector.multi_reduction <maximumf>, %126, %cst_79 [1] : vector<8x8xf32> to vector<8xf32>
    %128 = vector.shape_cast %127 : vector<8xf32> to vector<8x1xf32>
    %129 = vector.broadcast %128 : vector<8x1xf32> to vector<8x8xf32>
    %130 = arith.subf %126, %129 : vector<8x8xf32>
    %131 = math.exp %130 : vector<8x8xf32>
    %cst_80 = arith.constant dense<0.000000e+00> : vector<8xf32>
    %132 = vector.multi_reduction <add>, %131, %cst_80 [1] : vector<8x8xf32> to vector<8xf32>
    %133 = vector.shape_cast %132 : vector<8xf32> to vector<8x1xf32>
    %134 = tpu.reciprocal %133 {approx = true} : vector<8x1xf32> -> vector<8x1xf32>
    %135 = vector.broadcast %134 : vector<8x1xf32> to vector<8x8xf32>
    %136 = arith.mulf %131, %135 : vector<8x8xf32>
    %137 = arith.mulf %136, %13 : vector<8x8xf32>
    %138 = arith.truncf %137 : vector<8x8xf32> to vector<8x8xbf16>
    %c3_81 = arith.constant 3 : index
    %c0_82 = arith.constant 0 : index
    %c0_83 = arith.constant 0 : index
    %139 = vector.load %arg17[%c3_81, %c0_82, %c0_83] : memref<4x8x8xbf16, #tpu.memory_space<vmem>>, vector<1x8x8xbf16>
    %140 = vector.shape_cast %139 : vector<1x8x8xbf16> to vector<8x8xbf16>
    %cst_84 = arith.constant dense<0.000000e+00> : vector<8x8xf32>
    %141 = tpu.matmul %138, %140, %cst_84 {dimension_numbers = #tpu.dot_dimension_numbers<[1], [0], [0], [1], [0, 0, 1, 1], [], []>} : vector<8x8xbf16>, vector<8x8xbf16>, vector<8x8xf32> -> vector<8x8xf32>
    %142 = arith.truncf %141 : vector<8x8xf32> to vector<8x8xbf16>
    %c3_85 = arith.constant 3 : index
    %c0_86 = arith.constant 0 : index
    %c0_87 = arith.constant 0 : index
    %143 = vector.load %arg11[%c3_85, %c0_86, %c0_87] : memref<4x8x32xbf16, #tpu.memory_space<vmem>>, vector<1x8x32xbf16>
    %144 = vector.shape_cast %143 : vector<1x8x32xbf16> to vector<8x32xbf16>
    %cst_88 = arith.constant dense<0.000000e+00> : vector<8x32xf32>
    %145 = tpu.matmul %142, %144, %cst_88 {dimension_numbers = #tpu.dot_dimension_numbers<[1], [0], [0], [1], [0, 0, 1, 1], [], []>} : vector<8x8xbf16>, vector<8x32xbf16>, vector<8x32xf32> -> vector<8x32xf32>
    %146 = arith.addf %113, %145 : vector<8x32xf32>
    %c0_89 = arith.constant 0 : index
    %c0_90 = arith.constant 0 : index
    %147 = vector.load %arg12[%c0_89, %c0_90] : memref<1x32xf32, #tpu.memory_space<vmem>>, vector<1x32xf32>
    %148 = vector.broadcast %147 : vector<1x32xf32> to vector<8x32xf32>
    %149 = arith.addf %146, %148 : vector<8x32xf32>
    %150 = arith.addf %149, %7 : vector<8x32xf32>
    %cst_91 = arith.constant dense<0.000000e+00> : vector<8xf32>
    %151 = vector.multi_reduction <add>, %150, %cst_91 [1] : vector<8x32xf32> to vector<8xf32>
    %152 = vector.shape_cast %151 : vector<8xf32> to vector<8x1xf32>
    %cst_92 = arith.constant 3.200000e+01 : f32
    %153 = vector.broadcast %cst_92 : f32 to vector<8x1xf32>
    %154 = arith.divf %152, %153 : vector<8x1xf32>
    %155 = vector.broadcast %154 : vector<8x1xf32> to vector<8x32xf32>
    %156 = arith.subf %150, %155 : vector<8x32xf32>
    %157 = arith.mulf %156, %156 : vector<8x32xf32>
    %cst_93 = arith.constant dense<0.000000e+00> : vector<8xf32>
    %158 = vector.multi_reduction <add>, %157, %cst_93 [1] : vector<8x32xf32> to vector<8xf32>
    %159 = vector.shape_cast %158 : vector<8xf32> to vector<8x1xf32>
    %cst_94 = arith.constant 3.200000e+01 : f32
    %160 = vector.broadcast %cst_94 : f32 to vector<8x1xf32>
    %161 = arith.divf %159, %160 : vector<8x1xf32>
    %162 = vector.broadcast %154 : vector<8x1xf32> to vector<8x32xf32>
    %163 = arith.subf %150, %162 : vector<8x32xf32>
    %cst_95 = arith.constant 9.99999996E-13 : f32
    %164 = vector.broadcast %cst_95 : f32 to vector<8x1xf32>
    %165 = arith.addf %161, %164 : vector<8x1xf32>
    %166 = math.rsqrt %165 : vector<8x1xf32>
    %167 = vector.broadcast %166 : vector<8x1xf32> to vector<8x32xf32>
    %168 = arith.mulf %163, %167 : vector<8x32xf32>
    %c0_96 = arith.constant 0 : index
    %c0_97 = arith.constant 0 : index
    %169 = vector.load %arg13[%c0_96, %c0_97] : memref<1x32xf32, #tpu.memory_space<vmem>>, vector<1x32xf32>
    %170 = vector.broadcast %169 : vector<1x32xf32> to vector<8x32xf32>
    %171 = arith.mulf %168, %170 : vector<8x32xf32>
    %c0_98 = arith.constant 0 : index
    %c0_99 = arith.constant 0 : index
    %172 = vector.load %arg14[%c0_98, %c0_99] : memref<1x32xf32, #tpu.memory_space<vmem>>, vector<1x32xf32>
    %173 = vector.broadcast %172 : vector<1x32xf32> to vector<8x32xf32>
    %174 = arith.addf %171, %173 : vector<8x32xf32>
    %c0_100 = arith.constant 0 : index
    %c0_101 = arith.constant 0 : index
    %c0_102 = arith.constant 0 : index
    %175 = vector.load %arg15[%c0_100, %c0_101, %c0_102] : memref<1x8x32xf32, #tpu.memory_space<vmem>>, vector<1x8x32xf32>
    %176 = vector.shape_cast %175 : vector<1x8x32xf32> to vector<8x32xf32>
    %177 = vector.shape_cast %174 : vector<8x32xf32> to vector<1x8x32xf32>
    tpu.vector_store %arg15[%c0_100, %c0_101, %c0_102], %177 {strides = array<i32>} : memref<1x8x32xf32, #tpu.memory_space<vmem>>, vector<1x8x32xf32>,
    return
  }
  func.func @transform_0(%arg0: i32, %arg1: i32) -> (i32, i32, i32) {
    %c0_i32 = arith.constant 0 : i32
    %c0_i32_0 = arith.constant 0 : i32
    %c0_i32_1 = arith.constant 0 : i32
    return %arg0, %c0_i32, %c0_i32_0 : i32, i32, i32
  }
  func.func @transform_1(%arg0: i32, %arg1: i32) -> (i32, i32, i32) {
    %c0_i32 = arith.constant 0 : i32
    %c0_i32_0 = arith.constant 0 : i32
    %c0_i32_1 = arith.constant 0 : i32
    return %arg0, %c0_i32, %c0_i32_0 : i32, i32, i32
  }
  func.func @transform_2(%arg0: i32, %arg1: i32) -> (i32, i32, i32) {
    %c0_i32 = arith.constant 0 : i32
    %c0_i32_0 = arith.constant 0 : i32
    return %arg0, %arg1, %c0_i32 : i32, i32, i32
  }
  func.func @transform_3(%arg0: i32, %arg1: i32) -> (i32, i32, i32) {
    %c0_i32 = arith.constant 0 : i32
    %c0_i32_0 = arith.constant 0 : i32
    %c0_i32_1 = arith.constant 0 : i32
    %c0_i32_2 = arith.constant 0 : i32
    return %c0_i32, %c0_i32_0, %c0_i32_1 : i32, i32, i32
  }
  func.func @transform_4(%arg0: i32, %arg1: i32) -> (i32, i32, i32) {
    %c0_i32 = arith.constant 0 : i32
    %c0_i32_0 = arith.constant 0 : i32
    %c0_i32_1 = arith.constant 0 : i32
    %c0_i32_2 = arith.constant 0 : i32
    return %c0_i32, %c0_i32_0, %c0_i32_1 : i32, i32, i32
  }
  func.func @transform_5(%arg0: i32, %arg1: i32) -> (i32, i32, i32) {
    %c0_i32 = arith.constant 0 : i32
    %c0_i32_0 = arith.constant 0 : i32
    %c0_i32_1 = arith.constant 0 : i32
    %c0_i32_2 = arith.constant 0 : i32
    return %c0_i32, %c0_i32_0, %c0_i32_1 : i32, i32, i32
  }
  func.func @transform_6(%arg0: i32, %arg1: i32) -> (i32, i32, i32) {
    %c0_i32 = arith.constant 0 : i32
    %c0_i32_0 = arith.constant 0 : i32
    %c0_i32_1 = arith.constant 0 : i32
    %c0_i32_2 = arith.constant 0 : i32
    return %c0_i32, %c0_i32_0, %c0_i32_1 : i32, i32, i32
  }
  func.func @transform_7(%arg0: i32, %arg1: i32) -> (i32, i32, i32) {
    %c0_i32 = arith.constant 0 : i32
    %c0_i32_0 = arith.constant 0 : i32
    %c0_i32_1 = arith.constant 0 : i32
    %c0_i32_2 = arith.constant 0 : i32
    return %c0_i32, %c0_i32_0, %c0_i32_1 : i32, i32, i32
  }
  func.func @transform_8(%arg0: i32, %arg1: i32) -> (i32, i32, i32) {
    %c0_i32 = arith.constant 0 : i32
    %c0_i32_0 = arith.constant 0 : i32
    %c0_i32_1 = arith.constant 0 : i32
    %c0_i32_2 = arith.constant 0 : i32
    return %c0_i32, %c0_i32_0, %c0_i32_1 : i32, i32, i32
  }
  func.func @transform_9(%arg0: i32, %arg1: i32) -> (i32, i32, i32) {
    %c0_i32 = arith.constant 0 : i32
    %c0_i32_0 = arith.constant 0 : i32
    %c0_i32_1 = arith.constant 0 : i32
    %c0_i32_2 = arith.constant 0 : i32
    return %c0_i32, %c0_i32_0, %c0_i32_1 : i32, i32, i32
  }
  func.func @transform_10(%arg0: i32, %arg1: i32) -> (i32, i32) {
    %c0_i32 = arith.constant 0 : i32
    %c0_i32_0 = arith.constant 0 : i32
    %c0_i32_1 = arith.constant 0 : i32
    return %c0_i32, %c0_i32_0 : i32, i32
  }
  func.func @transform_11(%arg0: i32, %arg1: i32) -> (i32, i32) {
    %c0_i32 = arith.constant 0 : i32
    %c0_i32_0 = arith.constant 0 : i32
    %c0_i32_1 = arith.constant 0 : i32
    return %c0_i32, %c0_i32_0 : i32, i32
  }
  func.func @transform_12(%arg0: i32, %arg1: i32) -> (i32, i32) {
    %c0_i32 = arith.constant 0 : i32
    %c0_i32_0 = arith.constant 0 : i32
    %c0_i32_1 = arith.constant 0 : i32
    return %c0_i32, %c0_i32_0 : i32, i32
  }
  func.func @transform_13(%arg0: i32, %arg1: i32) -> (i32, i32, i32) {
    %c0_i32 = arith.constant 0 : i32
    %c0_i32_0 = arith.constant 0 : i32
    return %arg0, %arg1, %c0_i32 : i32, i32, i32
  }
}

</mosaic_0001>

<bundles_post_ra>
// kernel: tpu_custom_call.1
= control target key start
LH: loop header
LB: loop body
LE: loop exit
PB: predicated region body
PF: predicated region fallthrough
CT: control target
= control target key end

     0   :  { %s3269_s0 = inlined_call_operand.vmem [shape: f32[2,8,32], index: 0, kind: input, shape index: {}]   ;;  %s3270_s1 = inlined_call_operand.vmem [shape: f32[2,1,8], index: 1, kind: input, shape index: {}]   ;;  %s3271_s2 = inlined_call_operand.vmem [shape: bf16[2,8,8], index: 2, kind: input, shape index: {}]   ;;  %s3272_s3 = inlined_call_operand.vmem [shape: bf16[4,32,8], index: 3, kind: input, shape index: {}]   ;;  %s3273_s4 = inlined_call_operand.vmem [shape: f32[4,1,8], index: 4, kind: input, shape index: {}]   ;;  %s3274_s5 = inlined_call_operand.vmem [shape: bf16[4,32,8], index: 5, kind: input, shape index: {}]   ;;  %s3275_s6 = inlined_call_operand.vmem [shape: f32[4,1,8], index: 6, kind: input, shape index: {}]   ;;  %s3276_s7 = inlined_call_operand.vmem [shape: bf16[4,32,8], index: 7, kind: input, shape index: {}]   ;;  %s3277_s8 = inlined_call_operand.vmem [shape: f32[4,1,8], index: 8, kind: input, shape index: {}]   ;;  %s3278_s9 = inlined_call_operand.vmem [shape: bf16[4,8,32], index: 9, kind: input, shape index: {}]   ;;  %s3279_s10 = inlined_call_operand.vmem [shape: f32[1,32], index: 10, kind: input, shape index: {}]   ;;  %s3280_s11 = inlined_call_operand.vmem [shape: f32[1,32], index: 11, kind: input, shape index: {}]   ;;  %s3281_s12 = inlined_call_operand.vmem [shape: f32[1,32], index: 12, kind: input, shape index: {}]   ;;  %s3282_s13 = inlined_call_operand.hbm [shape: f32[2,8,32], index: 13, kind: output, shape index: {}]  }
   0x1   :  { %3285 = sst [smem:[#allocation9_spill]] %s3269_s0 }
   0x2   :  { %3286 = sst [smem:[#allocation10_spill]] %s3270_s1 }
   0x3   :  { %3287 = sst [smem:[#allocation11_spill]] %s3271_s2 }
   0x4   :  { %18 = vsyncpa [#allocation5], 0 }
   0x5   :  { %20 = vsyncpa [#allocation5 + $0x1], 0  ;;  %s2835_s25 = smov 0   ;;  %s2837_s26 = smov 0  }
   0x6   :  { %s2839_s27 = smov 0   ;;  %s2841_s28 = smov 0  }
   0x7   :  { %s2843_s29 = smov 0   ;;  %s2845_s30 = smov 0  }
   0x8 LB: > { %3288 = sst [smem:[#allocation7_spill]] %s2756_s29  ;;  %s2231_s14 = sadd.s32 4294967295, %s2760_s30   ;;  %s2760_s30 = sphi %s2845_s30, %s26_s30   ;;  %s2756_s29 = sphi %s2843_s29, %s3296_s29   ;;  %s2752_s28 = sphi %s2841_s28, %s3295_s28   ;;  %s2748_s27 = sphi %s2839_s27, %s3299_s27   ;;  %s2744_s26 = sphi %s2837_s26, %s3298_s26   ;;  %s2740_s25 = sphi %s2835_s25, %s3297_s25  }
   0x9   : > { %s2232_s15 = sadd.s32 4294967294, %s2760_s30   ;;  %s38_s16 = sadd.s32 1, %s2756_s29 }
   0xa   : > { %s337_s17 = sadd.s32 1, %s2748_s27  ;;  %p40_p0 = scmp.ge.s32.totalorder %s38_s16, 2 }
   0xb   : > { %p347_p1 = scmp.ne.s32.totalorder %s2748_s27, %s2744_s26  ;;  %p348_p2 = scmp.eq.s32.totalorder %s2231_s14, 1 }
   0xc   : > { %p353_p3 = scmp.ne.s32.totalorder %s2744_s26, %s2740_s25  ;;  %s3301_s16 = smov (%p40_p0, %s38_s16), 0 }
   0xd   : > { %3289 = sst [smem:[#allocation8_spill]] %s3301_s16  ;;  %p2875_p4 = por %p348_p2, %p347_p1 }
   0xe   : > { %p354_p5 = scmp.eq.s32.totalorder %s2232_s15, 1  ;;  %s332_s19 = ssub.s32 %s2756_s29, %s3301_s16 }
   0xf   : > { %p2235_p6 = scmp.ge.s32.totalorder %s2760_s30, 1  ;;  %p335_p7 = scmp.eq.s32.totalorder %s332_s19, 0 }
  0x10   : > { %p2882_p8 = por %p354_p5, %p353_p3  ;;  %p425_p9 = scmp.lt.s32.totalorder %s2760_s30, 3 }
  0x11   : > { %s2888_s21 = scalar_select %p335_p7, %s2748_s27, %s337_s17  }
  0x12   : > { %p426_p10 = pnand %p2235_p6, %p425_p9 }
  0x13   : > { %v2640_v0 = vld [vmem:[%s3274_s5] sm:$0xff] (!%p426_p10)   ;;  %v2762_v1 = vmov (!%p426_p10), 0.0   ;;  %v2641_v2 = vld [vmem:[%s3274_s5 + $0x8] sm:$0xff] (!%p426_p10)   ;;  %vm2763_vm0 = vmmov (!%p426_p10), 0   ;;  %p478_p11 = scmp.lt.s32.totalorder (!%p426_p10), %s2752_s28, 1  ;;  %s3292_s0 = sld [smem:[#allocation9_spill]] (!%p426_p10) }
  0x14   : > { %429 = sbr.rel (%p426_p10) target bundleno = 3975 (0xf87), region = 72  ;;  %2415 = vmatprep.subr.bf16.mxu0 (!%p426_p10), %v2762_v1  ;;  %2423 = vmatprep.subr.bf16.mxu1 (!%p426_p10), %v2762_v1  ;;  %vm522_vm1 = vcmask (!%p426_p10), 261120   ;;  %v2642_v4 = vld [vmem:[%s3274_s5 + $0x10] sm:$0xff] (!%p426_p10)   ;;  %v2643_v6 = vld [vmem:[%s3274_s5 + $0x18] sm:$0xff] (!%p426_p10)   ;;  %v2644_v7 = vld [vmem:[%s3274_s5 + $0x20] sm:$0xff] (!%p426_p10)   ;;  %vm662_vm2 = vcmask (!%p426_p10), 60416  }
  0x15   : > { %2416 = vmatpush3.bf16.msra.mxu0 (!%p426_p10), %v2640_v0  ;;  %2419 = vmatprep.mubr.msk.bf16.mxu0 (!%p426_p10), %vm2763_vm0, %v2762_v1  ;;  %v2645_v8 = vld [vmem:[%s3274_s5 + $0x28] sm:$0xff] (!%p426_p10)   ;;  %v2646_v9 = vld [vmem:[%s3274_s5 + $0x30] sm:$0xff] (!%p426_p10)   ;;  %v2647_v10 = vld [vmem:[%s3274_s5 + $0x38] sm:$0xff] (!%p426_p10)   ;;  %vm1256_vm3 = vcmask (!%p426_p10), 1043456   ;;  %vm1252_vm4 = vcmask (!%p426_p10), 64512   ;;  %s3293_s1 = sld [smem:[#allocation10_spill]] (!%p426_p10) }
  0x16   : > { %2417 = vmatprep.subr.bf16.mxu0 (!%p426_p10), %v2762_v1  ;;  %2427 = vmatprep.mubr.msk.bf16.mxu1 (!%p426_p10), %vm2763_vm0, %v2762_v1  ;;  %v2648_v11 = vld [vmem:[%s3272_s3] sm:$0xff] (!%p426_p10)   ;;  %v2649_v12 = vld [vmem:[%s3272_s3 + $0x8] sm:$0xff] (!%p426_p10)   ;;  %v2652_v15 = vld [vmem:[%s3276_s7 + $0x10] sm:$0xff] (!%p426_p10)   ;;  %s3294_s2 = sld [smem:[#allocation11_spill]] (!%p426_p10) }
  0x17   : > { %v2650_v13 = vld [vmem:[%s3276_s7] sm:$0xff] (!%p426_p10)   ;;  %v2651_v14 = vld [vmem:[%s3276_s7 + $0x8] sm:$0xff] (!%p426_p10)   ;;  %v2653_v16 = vld [vmem:[%s3276_s7 + $0x18] sm:$0xff] (!%p426_p10)  }
  0x18   : > { %2424 = vmatpush3.bf16.msra.mxu1 (!%p426_p10), %v2650_v13  ;;  %v2654_v17 = vld [vmem:[%s3276_s7 + $0x20] sm:$0xff] (!%p426_p10)   ;;  %v2655_v18 = vld [vmem:[%s3276_s7 + $0x28] sm:$0xff] (!%p426_p10)   ;;  %v2656_v19 = vld [vmem:[%s3276_s7 + $0x30] sm:$0xff] (!%p426_p10)  }
  0x19   : > { %2418 = vmatpush3.bf16.msra.mxu0 (!%p426_p10), %v2641_v2  ;;  %2425 = vmatprep.subr.bf16.mxu1 (!%p426_p10), %v2762_v1  ;;  %v2239_v20 = vld [vmem:[%s3275_s6] ss:$0 sm:$0xff] (!%p426_p10)  ;;  %v2657_v25 = vld [vmem:[%s3276_s7 + $0x38] sm:$0xff] (!%p426_p10)   ;;  %v2261_v50 = vld [vmem:[%s3277_s8 + $0x1] ss:$0 sm:$0xff] (!%p426_p10) }
  0x1a   : > { %2431 = vmatprep.subr.bf16.mxu0 (!%p426_p10), %v2762_v1  ;;  %v2243_v43 = vld [vmem:[%s3277_s8] ss:$0 sm:$0xff] (!%p426_p10)  ;;  %v2279_v59 = vld [vmem:[%s3277_s8 + $0x2] ss:$0 sm:$0xff] (!%p426_p10)  ;;  %v2659_v13 = vld [vmem:[%s3272_s3 + $0x18] sm:$0xff] (!%p426_p10)  }
  0x1b   : > { %s2905_s15 = scalar_select %p478_p11, %s2752_s28, 1 }
  0x1c   : > { %2426 = vmatpush3.bf16.msra.mxu1 %v2651_v14 }
  0x1d   : > { %s2237_s17 = sshll.u32 %s2905_s15, 3  ;;  %2439 = vmatprep.subr.bf16.mxu1 %v2762_v1  ;;  %s484_s24 = scalar_lea.vmem %s3293_s1, %s2905_s15 }
  0x1e   : > { %s481_s23 = scalar_lea.vmem %s3292_s0, %s2237_s17  ;;  %s2238_s16 = sshll.u32 %s2905_s15, 2 }
  0x1f   : > { %v2912_v3 = vld [vmem:[%s481_s23] sm:$0xff] }
  0x20   : > { %v2919_v5 = vpack.c.bf16 %v2912_v3, %v2912_v3 }
  0x22   : > { %2420 = vmatmul.mubr.msk.bf16.vlgmr.msra.gmra.mrb[0].mxu0 %vm522_vm1, %v2919_v5  ;;  %2428 = vmatmul.mubr.msk.bf16.vlgmr.msra.gmra.mrb[0].mxu1 %vm522_vm1, %v2919_v5 }
  0x23   : > { %2432 = vmatpush3.bf16.msra.mxu0 %v2642_v4  ;;  %2435 = vmatprep.mubr.msk.bf16.mxu0 %vm2763_vm0, %v2762_v1 }
  0x24   : > { %2433 = vmatprep.subr.bf16.mxu0 %v2762_v1  ;;  %2440 = vmatpush3.bf16.msra.mxu1 %v2652_v15 }
  0x25   : > { %2443 = vmatprep.mubr.msk.bf16.mxu1 %vm2763_vm0, %v2762_v1  ;;  %2441 = vmatprep.subr.bf16.mxu1 %v2762_v1 }
  0x27   : > { %2434 = vmatpush3.bf16.msra.mxu0 %v2643_v6 }
  0x28   : > { %2447 = vmatprep.subr.bf16.mxu0 %v2762_v1  ;;  %2442 = vmatpush3.bf16.msra.mxu1 %v2653_v16  ;;  %v2297_v16 = vld [vmem:[%s3277_s8 + $0x3] ss:$0 sm:$0xff] }
  0x29   : > { %2455 = vmatprep.subr.bf16.mxu1 %v2762_v1 }
  0x2a   : > { %2436 = vmatmul.mubr.msk.bf16.vlgmr.msra.gmra.mrb[4].mxu0 %vm522_vm1, %v2919_v5 }
  0x2b   : > { %2448 = vmatpush3.bf16.msra.mxu0 %v2644_v7  ;;  %2451 = vmatprep.mubr.msk.bf16.mxu0 %vm2763_vm0, %v2762_v1  ;;  %v2301_v7 = vld [vmem:[%s3273_s4] ss:$0 sm:$0xff] }
  0x2c   : > { %2449 = vmatprep.subr.bf16.mxu0 %v2762_v1  ;;  %2444 = vmatmul.mubr.msk.bf16.vlgmr.msra.gmra.mrb[4].mxu1 %vm522_vm1, %v2919_v5 }
  0x2d   : > { %2456 = vmatpush3.bf16.msra.mxu1 %v2654_v17  ;;  %2459 = vmatprep.mubr.msk.bf16.mxu1 %vm2763_vm0, %v2762_v1 }
  0x2e   : > { %2457 = vmatprep.subr.bf16.mxu1 %v2762_v1 }
  0x2f   : > { %2450 = vmatpush3.bf16.msra.mxu0 %v2645_v8 }
  0x30   : > { %2463 = vmatprep.subr.bf16.mxu0 %v2762_v1 }
  0x31   : > { %2458 = vmatpush3.bf16.msra.mxu1 %v2655_v18 }
  0x32   : > { %2452 = vmatmul.mubr.msk.bf16.vlgmr.msra.gmra.mrb[8].mxu0 %vm522_vm1, %v2919_v5  ;;  %2471 = vmatprep.subr.bf16.mxu1 %v2762_v1 }
  0x33   : > { %2464 = vmatpush3.bf16.msra.mxu0 %v2646_v9  ;;  %2467 = vmatprep.mubr.msk.bf16.mxu0 %vm2763_vm0, %v2762_v1 }
  0x34   : > { %2465 = vmatprep.subr.bf16.mxu0 %v2762_v1  ;;  %2460 = vmatmul.mubr.msk.bf16.vlgmr.msra.gmra.mrb[8].mxu1 %vm522_vm1, %v2919_v5 }
  0x35   : > { %2472 = vmatpush3.bf16.msra.mxu1 %v2656_v19  ;;  %2475 = vmatprep.mubr.msk.bf16.mxu1 %vm2763_vm0, %v2762_v1 }
  0x36   : > { %2473 = vmatprep.subr.bf16.mxu1 %v2762_v1 }
  0x37   : > { %2466 = vmatpush3.bf16.msra.mxu0 %v2647_v10 }
  0x38   : > { %2479 = vmatprep.subr.bf16.mxu0 %v2762_v1 }
  0x39   : > { %2474 = vmatpush3.bf16.msra.mxu1 %v2657_v25 }
  0x3a   : > { %2468 = vmatmul.mubr.msk.bf16.vlgmr.msra.gmra.mrb[12].mxu0 %vm522_vm1, %v2919_v5  ;;  %2487 = vmatprep.subr.bf16.mxu1 %v2762_v1 }
  0x3b   : > { %2480 = vmatpush3.bf16.msra.mxu0 %v2648_v11  ;;  %2483 = vmatprep.mubr.msk.bf16.mxu0 %vm2763_vm0, %v2762_v1 }
  0x3c   : > { %2481 = vmatprep.subr.bf16.mxu0 %v2762_v1  ;;  %2476 = vmatmul.mubr.msk.bf16.vlgmr.msra.gmra.mrb[12].mxu1 %vm522_vm1, %v2919_v5 }
  0x3d   : > { %2489 = vmatprep.mubr.msk.bf16.mxu1 %vm2763_vm0, %v2762_v1 }
  0x3f   : > { %2482 = vmatpush3.bf16.msra.mxu0 %v2649_v12  ;;  %v2658_v12 = vld [vmem:[%s3272_s3 + $0x10] sm:$0xff]  }
  0x40   : > { %2493 = vmatprep.subr.bf16.mxu0 %v2762_v1 }
  0x42   : > { %2484 = vmatmul.mubr.msk.bf16.vlgmr.msra.gmra.mrb[16].mxu0 %vm522_vm1, %v2919_v5 }
  0x43   : > { %2495 = vmatprep.mubr.msk.bf16.mxu0 %vm2763_vm0, %v2762_v1 }
  0xf5   : > { %v560_v21 = vpop.f32.mrb[0].mxu0  ;;  %v623_v44 = vpop.f32.mrb[0].mxu1 }
  0xf6   : > { %v2421_v22 = vpop.f32.mrb[1].mxu0  ;;  %v561_v23 = vadd.f32 %v2239_v20, %v560_v21  ;;  %v624_v45 = vadd.f32 %v2243_v43, %v623_v44  ;;  %v2429_v46 = vpop.f32.mrb[1].mxu1 }
  0xf7   : > { %v563_v24 = vpop.f32.mrb[2].mxu0  ;;  %v626_v47 = vpop.f32.mrb[2].mxu1 }
  0xf8   : > { %629 = vxpose.xlu0.b32.start.end [1/1] (short) (narrow) %v561_v23, 8  ;;  %v2422_v26 = vpop.f32.mrb[3].mxu0  ;;  %v664_v48 = vpack.c.bf16 %v624_v45, %v624_v45  ;;  %v2430_v49 = vpop.f32.mrb[3].mxu1  ;;  %v3072_v23 = vld [vmem:[%s484_s24] ss:$0 sm:$0xff]  ;;  %s491_s24 = scalar_lea.vmem %s3294_s2, %s2238_s16  ;;  %s2352_s16 = sshll.u32 %s2752_s28, 7 }
  0xf9   : > { %s3221_s2 = scalar_lea.hbm %s3282_s13, %s2352_s16  ;;  %s2764_s28 = smov [#allocation4]  }
  0xfa   : > { %665 = vst.msk [vmem:[#allocation3] sm:$0xf] %vm662_vm2, %v664_v48 }
  0xfd   : > { %v3019_v27 = vpop.f32.mrb[4].mxu0 }
  0xfe   : > { %v2437_v28 = vpop.f32.mrb[5].mxu0 }
  0xff   : > { %v728_v29 = vpop.f32.mrb[6].mxu0  ;;  %v790_v51 = vpop.f32.mrb[4].mxu1 }
 0x100   : > { %v2438_v30 = vpop.f32.mrb[7].mxu0  ;;  %v791_v52 = vadd.f32 %v2261_v50, %v790_v51  ;;  %v2445_v53 = vpop.f32.mrb[5].mxu1 }
 0x101   : > { %v793_v54 = vpop.f32.mrb[6].mxu1  ;;  %v1313_v57 = vld [vmem:[#allocation3] sm:$0xf]  ;;  %v2313_v53 = vld [vmem:[%s3273_s4 + $0x1] ss:$0 sm:$0xff] }
 0x102   : > { %v831_v55 = vpack.c.bf16 %v791_v52, %v791_v52  ;;  %v2446_v56 = vpop.f32.mrb[7].mxu1  ;;  %v1318_v58 = vsel %vm1256_vm3, %v1313_v57, 0 }
 0x103   : > { %2494 = vmatpush3.bf16.msra.mxu0 %v1318_v58 }
 0x104   : > { %833 = vst.msk [vmem:[#allocation3 + $0x4] sm:$0xf] %vm662_vm2, %v831_v55  ;;  %2507 = vmatprep.subr.bf16.mxu0 %v2762_v1 }
 0x105   : > { %v3023_v31 = vpop.f32.mrb[8].mxu0 }
 0x106   : > { %v2453_v32 = vpop.f32.mrb[9].mxu0 }
 0x107   : > { %v896_v33 = vpop.f32.mrb[10].mxu0  ;;  %v958_v60 = vpop.f32.mrb[8].mxu1 }
 0x108   : > { %v2454_v34 = vpop.f32.mrb[11].mxu0  ;;  %v959_v61 = vadd.f32 %v2279_v59, %v958_v60  ;;  %v2461_v62 = vpop.f32.mrb[9].mxu1 }
 0x109   : > { %v961_v63 = vpop.f32.mrb[10].mxu1 }
 0x10a   : > { %v999_v0 = vpack.c.bf16 %v959_v61, %v959_v61  ;;  %v2462_v2 = vpop.f32.mrb[11].mxu1 }
 0x10b   : > { %v1490_v14 = vld [vmem:[#allocation3 + $0x4] sm:$0xf] }
 0x10c   : > { %1001 = vst.msk [vmem:[#allocation3 + $0x8] sm:$0xf] %vm662_vm2, %v999_v0  ;;  %v1495_v15 = vsel %vm1256_vm3, %v1490_v14, 0 }
 0x10d   : > { %v3025_v35 = vpop.f32.mrb[12].mxu0 }
 0x10e   : > { %v2469_v36 = vpop.f32.mrb[13].mxu0 }
 0x10f   : > { %v1064_v37 = vpop.f32.mrb[14].mxu0  ;;  %v1126_v17 = vpop.f32.mrb[12].mxu1 }
 0x110   : > { %v2470_v38 = vpop.f32.mrb[15].mxu0  ;;  %v1127_v18 = vadd.f32 %v2297_v16, %v1126_v17  ;;  %v2477_v19 = vpop.f32.mrb[13].mxu1  ;;  %v1361_v17 = vld [vmem:[%s3278_s9] sm:$0xf] }
 0x111   : > { %v1129_v20 = vpop.f32.mrb[14].mxu1  ;;  %v2252_v38 = vld [vmem:[%s3275_s6 + $0x1] ss:$0 sm:$0xff] }
 0x112   : > { %v1167_v21 = vpack.c.bf16 %v1127_v18, %v1127_v18  ;;  %v2478_v22 = vpop.f32.mrb[15].mxu1  ;;  %v1590_v20 = vsel %vm1256_vm3, %v1361_v17, 0 }
 0x114   : > { %1169 = vst.msk [vmem:[#allocation3 + $0xc] sm:$0xf] %vm662_vm2, %v1167_v21 }
 0x115   : > { %v1238_v39 = vpop.f32.mrb[16].mxu0 }
 0x116   : > { %v2485_v40 = vpop.f32.mrb[17].mxu0  ;;  %v1239_v8 = vadd.f32 %v2301_v7, %v1238_v39  ;;  %v726_v39 = vadd.f32 %v2252_v38, %v3019_v27  ;;  %v1175_v27 = vld [vmem:[%s491_s24] sm:$0xf]  ;;  %s475_s24 = sand.u32 1, %s2744_s26  }
 0x117   : > { %v1241_v41 = vpop.f32.mrb[18].mxu0  ;;  %v2270_v40 = vld [vmem:[%s3275_s6 + $0x2] ss:$0 sm:$0xff]  ;;  %v3089_v47 = vunpack.c.l.bf16 %v1175_v27  ;;  %s2236_s15 = sshll.u32 %s475_s24, 3  ;;  %s2123_s14 = scalar_lea.sflag [#allocation5], %s475_s24 }
 0x118   : > { %v2486_v42 = vpop.f32.mrb[19].mxu0  ;;  %v1244_v10 = vpack.c.bf16 %v1239_v8, %v1239_v8  ;;  %v894_v41 = vadd.f32 %v2270_v40, %v3023_v31  ;;  %s477_s22 = scalar_lea.vmem [#allocation4], %s2236_s15  ;;  %s2686_s15 = sshll.u32 %s2764_s28, 4  ;;  %s2687_s15 = int_to_ptr.vmem [resolvable:$false] %s2686_s15 }
 0x119   : > { %s2137_s23 = sshll.u32 %s477_s22, 4  ;;  %s2688_s19 = scalar_lea.vmem %s2687_s15, 256  ;;  %s3223_s23 = int_to_ptr.vmem [resolvable:$true] %s2137_s23 }
 0x11a   : > { %s2682_s17 = scalar_lea.vmem %s3223_s23, 128  ;;  %p2689_p1 = scmp.lt.s32.totalorder %s3223_s23, %s2687_s15 }
 0x11b   : > { %p2683_p12 = scmp.ne.s32.totalorder %s3223_s23, %s2682_s17  ;;  %p2690_p2 = scmp.lt.s32.totalorder %s2688_s19, %s2682_s17 }
 0x11d   : > { %p2684_p13 = pnand %p2683_p12, %p2875_p4  ;;  %p2691_p3 = por %p2690_p2, %p2689_p1 }
 0x11f   : > { %p2685_p0 = pneg %p2684_p13 }
 0x121   : > { %p2692_p5 = pnand %p2691_p3, %p2685_p0 }
 0x178   : > { %v645_v4 = vpop.trf.xlu0 }
 0x179   : > { %v661_v6 = vpack.c.bf16 %v645_v4, %v645_v4 }
 0x17b   : > { %663 = vst.msk [vmem:[#allocation2] sm:$0xf] %vm662_vm2, %v661_v6 }
 0x182   : > { %v1245_v9 = vld [vmem:[#allocation2] sm:$0xf] }
 0x183   : > { %v1258_v11 = vsel %vm1256_vm3, %v1245_v9, 0 }
 0x184   : > { %2488 = vmatpush3.bf16.msra.mxu1 %v1258_v11 }
 0x185   : > { %2499 = vmatprep.subr.bf16.mxu1 %v2762_v1 }
 0x187   : > { %2490 = vmatmul.mubr.msk.bf16.vlgmr.msra.gmra.mrb[16].mxu1 %vm1252_vm4, %v1244_v10 }
 0x188   : > { %2500 = vmatpush3.bf16.msra.mxu1 %v2658_v12  ;;  %2503 = vmatprep.mubr.msk.bf16.mxu1 %vm2763_vm0, %v2762_v1  ;;  %v2319_v12 = vld [vmem:[%s3278_s9 + $0x4] sm:$0xf] }
 0x189   : > { %2501 = vmatprep.subr.bf16.mxu1 %v2762_v1 }
 0x18c   : > { %2502 = vmatpush3.bf16.msra.mxu1 %v2659_v13  ;;  %v1544_v13 = vsel %vm1256_vm3, %v2319_v12, 0 }
 0x18d   : > { %2513 = vmatprep.subr.bf16.mxu1 %v2762_v1 }
 0x18f   : > { %2504 = vmatmul.mubr.msk.bf16.vlgmr.msra.gmra.mrb[20].mxu1 %vm522_vm1, %v2919_v5 }
 0x190   : > { %2514 = vmatpush3.bf16.msra.mxu1 %v1495_v15  ;;  %2515 = vmatprep.mubr.msk.bf16.mxu1 %vm2763_vm0, %v2762_v1 }
 0x191   : > { %2525 = vmatprep.subr.bf16.mxu1 %v2762_v1 }
 0x25a   : > { %v1294_v24 = vpop.f32.mrb[16].mxu1 }
 0x25b   : > { %v1295_v25 = vadd.f32 %v3072_v23, %v1294_v24  ;;  %v2491_v26 = vpop.f32.mrb[17].mxu1 }
 0x25c   : > { %v1297_v28 = vpop.f32.mrb[18].mxu1  ;;  %v2660_v26 = vld [vmem:[%s3272_s3 + $0x20] sm:$0xff]  }
 0x25d   : > { %v2492_v29 = vpop.f32.mrb[19].mxu1  ;;  %v1300_v30 = vsel %vm1252_vm4, %v1295_v25, -inf }
 0x25e   : > { %1301 = vmax.xlane.f32.xlu0 %v1300_v30 }
 0x262   : > { %v1421_v42 = vpop.f32.mrb[20].mxu1 }
 0x263   : > { %v2505_v43 = vpop.f32.mrb[21].mxu1  ;;  %v1422_v54 = vadd.f32 %v2313_v53, %v1421_v42 }
 0x264   : > { %v1424_v44 = vpop.f32.mrb[22].mxu1 }
 0x265   : > { %v2506_v45 = vpop.f32.mrb[23].mxu1  ;;  %v1427_v56 = vpack.c.bf16 %v1422_v54, %v1422_v54 }
 0x2eb   : > { %v1302_v32 = vpop.xlane.xlu0 %1301 }
 0x2ec   : > { %v1303_v33 = vsub.f32 %v1295_v25, %v1302_v32 }
 0x2ee   : > { %v1304_v34 = vmul.f32 1.442695, %v1303_v33  ;;  %v2661_v33 = vld [vmem:[%s3272_s3 + $0x28] sm:$0xff]  }
 0x2f0   : > { %2664 = vpow2.f32 %v1304_v34 }
 0x2fa   : > { %v2665_v36 = vpop.eup %2664 }
 0x2fb   : > { %v1306_v37 = vsel %vm1252_vm4, %v2665_v36, 0.0 }
 0x2fc   : > { %1307 = vadd.xlane.f32.xlu1 %v1306_v37 }
 0x32f   : > { %796 = vxpose.xlu1.b32.start.end [1/1] (short) (narrow) %v726_v39, 8 }
 0x333   : > { %964 = vxpose.xlu1.b32.start.end [1/1] (short) (narrow) %v894_v41, 8 }
 0x389   : > { %v1308_v46 = vpop.xlane.xlu1 %1307 }
 0x38a   : > { %2666 = vrcp.f32 %v1308_v46 }
 0x394   : > { %v2667_v48 = vpop.eup %2666 }
 0x395   : > { %v1310_v49 = vmul.f32 %v2667_v48, %v2665_v36  ;;  %v1760_v36 = vld [vmem:[#allocation3 + $0x8] sm:$0xf]  ;;  %v2327_v48 = vld [vmem:[%s3273_s4 + $0x2] ss:$0 sm:$0xff] }
 0x396   : > { %v1765_v40 = vsel %vm1256_vm3, %v1760_v36, 0 }
 0x397   : > { %v1311_v50 = vmul.f32 %v1310_v49, %v3089_v47 }
 0x399   : > { %v1312_v31 = vpack.c.bf16 %v1311_v50, %v1311_v50 }
 0x39b   : > { %2496 = vmatmul.mubr.msk.bf16.vlgmr.msra.gmra.mrb[20].mxu0 %vm1252_vm4, %v1312_v31 }
 0x39c   : > { %2509 = vmatprep.mubr.msk.bf16.mxu0 %vm2763_vm0, %v2762_v1 }
 0x3af   : > { %v812_v51 = vpop.trf.xlu1 }
 0x3b0   : > { %v828_v52 = vpack.c.bf16 %v812_v51, %v812_v51 }
 0x3b2   : > { %830 = vst.msk [vmem:[#allocation2 + $0x4] sm:$0xf] %vm662_vm2, %v828_v52 }
 0x3b3   : > { %v980_v22 = vpop.trf.xlu1 }
 0x3b4   : > { %v996_v24 = vpack.c.bf16 %v980_v22, %v980_v22 }
 0x3b6   : > { %998 = vst.msk [vmem:[#allocation2 + $0x8] sm:$0xf] %vm662_vm2, %v996_v24 }
 0x3b9   : > { %v1429_v55 = vld [vmem:[#allocation2 + $0x4] sm:$0xf] }
 0x3ba   : > { %v1434_v57 = vsel %vm1256_vm3, %v1429_v55, 0 }
 0x3bb   : > { %2508 = vmatpush3.bf16.msra.mxu0 %v1434_v57 }
 0x3bc   : > { %2519 = vmatprep.subr.bf16.mxu0 %v2762_v1 }
 0x3bd   : > { %v1699_v41 = vld [vmem:[#allocation2 + $0x8] sm:$0xf] }
 0x3be   : > { %2510 = vmatmul.mubr.msk.bf16.vlgmr.msra.gmra.mrb[24].mxu0 %vm1252_vm4, %v1427_v56  ;;  %v1704_v42 = vsel %vm1256_vm3, %v1699_v41, 0 }
 0x3bf   : > { %2521 = vmatprep.mubr.msk.bf16.mxu0 %vm2763_vm0, %v2762_v1  ;;  %2520 = vmatpush3.bf16.msra.mxu0 %v1544_v13  ;;  %v2663_v13 = vld [vmem:[%s3272_s3 + $0x38] sm:$0xff]  }
 0x3c0   : > { %2531 = vmatprep.subr.bf16.mxu0 %v2762_v1 }
 0x46e   : > { %v1354_v58 = vpop.f32.mrb[20].mxu0 }
 0x46f   : > { %v2497_v59 = vpop.f32.mrb[21].mxu0  ;;  %v1360_v21 = vpack.c.bf16 %v1354_v58, %v1354_v58 }
 0x470   : > { %v1357_v60 = vpop.f32.mrb[22].mxu0 }
 0x471   : > { %v2498_v61 = vpop.f32.mrb[23].mxu0  ;;  %v2288_v60 = vld [vmem:[%s3275_s6 + $0x3] ss:$0 sm:$0xff] }
 0x472   : > { %v1062_v61 = vadd.f32 %v2288_v60, %v3025_v35  ;;  %v2662_v35 = vld [vmem:[%s3272_s3 + $0x30] sm:$0xff]  }
 0x491   : > { %v1470_v62 = vpop.f32.mrb[24].mxu0 }
 0x492   : > { %v1471_v63 = vadd.f32 %v3072_v23, %v1470_v62  ;;  %v2511_v0 = vpop.f32.mrb[25].mxu0 }
 0x493   : > { %v1473_v2 = vpop.f32.mrb[26].mxu0 }
 0x494   : > { %v1476_v4 = vsel %vm1252_vm4, %v1471_v63, -inf  ;;  %v2512_v6 = vpop.f32.mrb[27].mxu0 }
 0x495   : > { %1477 = vmax.xlane.f32.xlu0 %v1476_v4 }
 0x522   : > { %v1478_v7 = vpop.xlane.xlu0 %1477 }
 0x523   : > { %v1479_v8 = vsub.f32 %v1471_v63, %v1478_v7 }
 0x525   : > { %v1480_v9 = vmul.f32 1.442695, %v1479_v8 }
 0x527   : > { %2668 = vpow2.f32 %v1480_v9 }
 0x531   : > { %v2669_v10 = vpop.eup %2668 }
 0x532   : > { %v1482_v11 = vsel %vm1252_vm4, %v2669_v10, 0.0 }
 0x533   : > { %1483 = vadd.xlane.f32.xlu0 %v1482_v11 }
 0x5c0   : > { %v1484_v14 = vpop.xlane.xlu0 %1483 }
 0x5c1   : > { %2670 = vrcp.f32 %v1484_v14  ;;  %v1985_v14 = vld [vmem:[#allocation3 + $0xc] sm:$0xf] }
 0x5cb   : > { %v2671_v15 = vpop.eup %2670 }
 0x5cc   : > { %v1486_v16 = vmul.f32 %v2671_v15, %v2669_v10  ;;  %v1990_v15 = vsel %vm1256_vm3, %v1985_v14, 0 }
 0x5ce   : > { %v1487_v18 = vmul.f32 %v1486_v16, %v3089_v47  ;;  %v2333_v16 = vld [vmem:[%s3278_s9 + $0x8] sm:$0xf] }
 0x5cf   : > { %v1814_v17 = vsel %vm1256_vm3, %v2333_v16, 0  ;;  %v2350_v16 = vld [vmem:[%s3281_s12] ss:$0 sm:$0xff] }
 0x5d0   : > { %v1488_v19 = vpack.c.bf16 %v1487_v18, %v1487_v18 }
 0x5d2   : > { %2516 = vmatmul.mubr.msk.bf16.vlgmr.msra.gmra.mrb[24].mxu1 %vm1252_vm4, %v1488_v19 }
 0x5d3   : > { %2526 = vmatpush3.bf16.msra.mxu1 %v1590_v20  ;;  %2527 = vmatprep.mubr.msk.bf16.mxu1 %vm2763_vm0, %v2762_v1 }
 0x5d4   : > { %2539 = vmatprep.subr.bf16.mxu1 %v2762_v1 }
 0x5da   : > { %2528 = vmatmul.mubr.msk.bf16.vlgmr.msra.gmra.mrb[28].mxu1 %vm1252_vm4, %v1360_v21 }
 0x5db   : > { %2541 = vmatprep.mubr.msk.bf16.mxu1 %vm2763_vm0, %v2762_v1  ;;  %2540 = vmatpush3.bf16.msra.mxu1 %v1704_v42 }
 0x5dc   : > { %2551 = vmatprep.subr.bf16.mxu1 %v2762_v1 }
 0x6a5   : > { %v1531_v25 = vpop.f32.mrb[24].mxu1 }
 0x6a6   : > { %v1537_v28 = vpack.c.bf16 %v1531_v25, %v1531_v25  ;;  %v2517_v29 = vpop.f32.mrb[25].mxu1  ;;  %v2340_v25 = vld [vmem:[%s3273_s4 + $0x3] ss:$0 sm:$0xff] }
 0x6a7   : > { %v1534_v30 = vpop.f32.mrb[26].mxu1 }
 0x6a8   : > { %v2518_v32 = vpop.f32.mrb[27].mxu1  ;;  %2522 = vmatmul.mubr.msk.bf16.vlgmr.msra.gmra.mrb[28].mxu0 %vm1252_vm4, %v1537_v28 }
 0x6a9   : > { %2532 = vmatpush3.bf16.msra.mxu0 %v2660_v26  ;;  %2535 = vmatprep.mubr.msk.bf16.mxu0 %vm2763_vm0, %v2762_v1 }
 0x6aa   : > { %2533 = vmatprep.subr.bf16.mxu0 %v2762_v1 }
 0x6ad   : > { %2534 = vmatpush3.bf16.msra.mxu0 %v2661_v33  ;;  %v1626_v34 = vpop.f32.mrb[28].mxu1 }
 0x6ae   : > { %v2529_v37 = vpop.f32.mrb[29].mxu1  ;;  %2545 = vmatprep.subr.bf16.mxu0 %v2762_v1 }
 0x6af   : > { %v1629_v38 = vpop.f32.mrb[30].mxu1 }
 0x6b0   : > { %v2530_v39 = vpop.f32.mrb[31].mxu1  ;;  %2536 = vmatmul.mubr.msk.bf16.vlgmr.msra.gmra.mrb[32].mxu0 %vm522_vm1, %v2919_v5 }
 0x6b1   : > { %2546 = vmatpush3.bf16.msra.mxu0 %v1765_v40  ;;  %2547 = vmatprep.mubr.msk.bf16.mxu0 %vm2763_vm0, %v2762_v1 }
 0x6b2   : > { %2557 = vmatprep.subr.bf16.mxu0 %v2762_v1 }
 0x77b   : > { %v1580_v43 = vpop.f32.mrb[28].mxu0 }
 0x77c   : > { %v3144_v44 = vadd.f32 %v1626_v34, %v1580_v43  ;;  %v2523_v45 = vpop.f32.mrb[29].mxu0 }
 0x77d   : > { %v1583_v46 = vpop.f32.mrb[30].mxu0 }
 0x77e   : > { %v2524_v27 = vpop.f32.mrb[31].mxu0 }
 0x783   : > { %v1691_v49 = vpop.f32.mrb[32].mxu0 }
 0x784   : > { %v1692_v50 = vadd.f32 %v2327_v48, %v1691_v49  ;;  %v2537_v31 = vpop.f32.mrb[33].mxu0 }
 0x785   : > { %v1694_v51 = vpop.f32.mrb[34].mxu0 }
 0x786   : > { %v1697_v52 = vpack.c.bf16 %v1692_v50, %v1692_v50  ;;  %v2538_v53 = vpop.f32.mrb[35].mxu0 }
 0x787   : > { %v2346_v53 = vld [vmem:[%s3278_s9 + $0xc] sm:$0xf] }
 0x788   : > { %2542 = vmatmul.mubr.msk.bf16.vlgmr.msra.gmra.mrb[32].mxu1 %vm1252_vm4, %v1697_v52 }
 0x789   : > { %2553 = vmatprep.mubr.msk.bf16.mxu1 %vm2763_vm0, %v2762_v1  ;;  %2552 = vmatpush3.bf16.msra.mxu1 %v1814_v17 }
 0x78a   : > { %2565 = vmatprep.subr.bf16.mxu1 %v2762_v1 }
 0x85b   : > { %v1740_v54 = vpop.f32.mrb[32].mxu1 }
 0x85c   : > { %v1741_v55 = vadd.f32 %v3072_v23, %v1740_v54  ;;  %v2543_v56 = vpop.f32.mrb[33].mxu1  ;;  %v2039_v54 = vsel %vm1256_vm3, %v2346_v53, 0 }
 0x85d   : > { %v1743_v57 = vpop.f32.mrb[34].mxu1 }
 0x85e   : > { %v1746_v58 = vsel %vm1252_vm4, %v1741_v55, -inf  ;;  %v2544_v59 = vpop.f32.mrb[35].mxu1 }
 0x85f   : > { %1747 = vmax.xlane.f32.xlu0 %v1746_v58 }
 0x88c   : > { %1132 = vxpose.xlu0.b32.start.end [1/1] (short) (narrow) %v1062_v61, 8 }
 0x8ec   : > { %v1748_v62 = vpop.xlane.xlu0 %1747 }
 0x8ed   : > { %v1749_v63 = vsub.f32 %v1741_v55, %v1748_v62 }
 0x8ef   : > { %v1750_v0 = vmul.f32 1.442695, %v1749_v63 }
 0x8f1   : > { %2672 = vpow2.f32 %v1750_v0 }
 0x8fb   : > { %v2673_v2 = vpop.eup %2672 }
 0x8fc   : > { %v1752_v4 = vsel %vm1252_vm4, %v2673_v2, 0.0 }
 0x8fd   : > { %1753 = vadd.xlane.f32.xlu1 %v1752_v4 }
 0x90c   : > { %v1148_v6 = vpop.trf.xlu0 }
 0x90d   : > { %v1164_v7 = vpack.c.bf16 %v1148_v6, %v1148_v6 }
 0x90f   : > { %1166 = vst.msk [vmem:[#allocation2 + $0xc] sm:$0xf] %vm662_vm2, %v1164_v7 }
 0x916   : > { %v1924_v18 = vld [vmem:[#allocation2 + $0xc] sm:$0xf] }
 0x98a   : > { %v1754_v8 = vpop.xlane.xlu1 %1753 }
 0x98b   : > { %2674 = vrcp.f32 %v1754_v8 }
 0x995   : > { %v2675_v9 = vpop.eup %2674 }
 0x996   : > { %v1756_v10 = vmul.f32 %v2675_v9, %v2673_v2 }
 0x998   : > { %v1757_v11 = vmul.f32 %v1756_v10, %v3089_v47 }
 0x99a   : > { %v1758_v12 = vpack.c.bf16 %v1757_v11, %v1757_v11 }
 0x99c   : > { %2548 = vmatmul.mubr.msk.bf16.vlgmr.msra.gmra.mrb[36].mxu0 %vm1252_vm4, %v1758_v12 }
 0x99d   : > { %2558 = vmatpush3.bf16.msra.mxu0 %v2662_v35  ;;  %2561 = vmatprep.mubr.msk.bf16.mxu0 %vm2763_vm0, %v2762_v1 }
 0x99e   : > { %2559 = vmatprep.subr.bf16.mxu0 %v2762_v1 }
 0x9a1   : > { %2560 = vmatpush3.bf16.msra.mxu0 %v2663_v13 }
 0x9a2   : > { %2571 = vmatprep.subr.bf16.mxu0 %v2762_v1 }
 0x9a4   : > { %2562 = vmatmul.mubr.msk.bf16.vlgmr.msra.gmra.mrb[40].mxu0 %vm522_vm1, %v2919_v5  ;;  %v1929_v5 = vsel %vm1256_vm3, %v1924_v18, 0 }
 0x9a5   : > { %2572 = vmatpush3.bf16.msra.mxu0 %v1990_v15  ;;  %2573 = vmatprep.mubr.msk.bf16.mxu0 %vm2763_vm0, %v2762_v1 }
 0xa6f   : > { %v1801_v19 = vpop.f32.mrb[36].mxu0 }
 0xa70   : > { %v1807_v20 = vpack.c.bf16 %v1801_v19, %v1801_v19  ;;  %v2549_v21 = vpop.f32.mrb[37].mxu0 }
 0xa71   : > { %v1804_v22 = vpop.f32.mrb[38].mxu0 }
 0xa72   : > { %v2550_v24 = vpop.f32.mrb[39].mxu0  ;;  %2554 = vmatmul.mubr.msk.bf16.vlgmr.msra.gmra.mrb[36].mxu1 %vm1252_vm4, %v1807_v20 }
 0xa73   : > { %2566 = vmatpush3.bf16.msra.mxu1 %v1929_v5  ;;  %2567 = vmatprep.mubr.msk.bf16.mxu1 %vm2763_vm0, %v2762_v1 }
 0xa74   : > { %2577 = vmatprep.subr.bf16.mxu1 %v2762_v1 }
 0xa77   : > { %v1916_v26 = vpop.f32.mrb[40].mxu0 }
 0xa78   : > { %v1917_v28 = vadd.f32 %v2340_v25, %v1916_v26  ;;  %v2563_v29 = vpop.f32.mrb[41].mxu0 }
 0xa79   : > { %v1919_v30 = vpop.f32.mrb[42].mxu0 }
 0xa7a   : > { %v1922_v32 = vpack.c.bf16 %v1917_v28, %v1917_v28  ;;  %v2564_v33 = vpop.f32.mrb[43].mxu0 }
 0xa7c   : > { %2568 = vmatmul.mubr.msk.bf16.vlgmr.msra.gmra.mrb[40].mxu1 %vm1252_vm4, %v1922_v32 }
 0xa7d   : > { %2579 = vmatprep.mubr.msk.bf16.mxu1 %vm2763_vm0, %v2762_v1  ;;  %2578 = vmatpush3.bf16.msra.mxu1 %v2039_v54 }
 0xb45   : > { %v1850_v34 = vpop.f32.mrb[36].mxu1 }
 0xb46   : > { %v1856_v36 = vadd.f32 %v1850_v34, %v3144_v44  ;;  %v2555_v37 = vpop.f32.mrb[37].mxu1 }
 0xb47   : > { %v1853_v38 = vpop.f32.mrb[38].mxu1 }
 0xb48   : > { %v2556_v39 = vpop.f32.mrb[39].mxu1 }
 0xb4f   : > { %v1965_v40 = vpop.f32.mrb[40].mxu1 }
 0xb50   : > { %v1966_v41 = vadd.f32 %v3072_v23, %v1965_v40  ;;  %v2569_v42 = vpop.f32.mrb[41].mxu1 }
 0xb51   : > { %v1968_v43 = vpop.f32.mrb[42].mxu1 }
 0xb52   : > { %v1971_v45 = vsel %vm1252_vm4, %v1966_v41, -inf  ;;  %v2570_v46 = vpop.f32.mrb[43].mxu1 }
 0xb53   : > { %1972 = vmax.xlane.f32.xlu1 %v1971_v45 }
 0xbe0   : > { %v1973_v27 = vpop.xlane.xlu1 %1972 }
 0xbe1   : > { %v1974_v48 = vsub.f32 %v1966_v41, %v1973_v27 }
 0xbe3   : > { %v1975_v49 = vmul.f32 1.442695, %v1974_v48 }
 0xbe5   : > { %2676 = vpow2.f32 %v1975_v49 }
 0xbef   : > { %v2677_v1 = vpop.eup %2676 }
 0xbf0   : > { %v1977_v50 = vsel %vm1252_vm4, %v2677_v1, 0.0 }
 0xbf1   : > { %1978 = vadd.xlane.f32.xlu1 %v1977_v50 }
 0xc7e   : > { %v1979_v44 = vpop.xlane.xlu1 %1978 }
 0xc7f   : > { %2678 = vrcp.f32 %v1979_v44 }
 0xc89   : > { %v2679_v31 = vpop.eup %2678 }
 0xc8a   : > { %v1981_v51 = vmul.f32 %v2679_v31, %v2677_v1 }
 0xc8c   : > { %v1982_v23 = vmul.f32 %v1981_v51, %v3089_v47  ;;  %v2348_v47 = vld [vmem:[%s3279_s10] ss:$0 sm:$0xff] }
 0xc8e   : > { %v1983_v52 = vpack.c.bf16 %v1982_v23, %v1982_v23 }
 0xc90   : > { %2574 = vmatmul.mubr.msk.bf16.vlgmr.msra.gmra.mrb[44].mxu0 %vm1252_vm4, %v1983_v52 }
 0xd63   : > { %v2026_v55 = vpop.f32.mrb[44].mxu0 }
 0xd64   : > { %v2032_v56 = vpack.c.bf16 %v2026_v55, %v2026_v55  ;;  %v2575_v57 = vpop.f32.mrb[45].mxu0 }
 0xd65   : > { %v2029_v58 = vpop.f32.mrb[46].mxu0 }
 0xd66   : > { %v2576_v59 = vpop.f32.mrb[47].mxu0  ;;  %2580 = vmatmul.mubr.msk.bf16.vlgmr.msra.gmra.mrb[44].mxu1 %vm1252_vm4, %v2032_v56 }
 0xe39   : > { %v2075_v60 = vpop.f32.mrb[44].mxu1 }
 0xe3a   : > { %v2081_v61 = vadd.f32 %v2075_v60, %v1856_v36  ;;  %v2581_v62 = vpop.f32.mrb[45].mxu1 }
 0xe3b   : > { %v2078_v63 = vpop.f32.mrb[46].mxu1 }
 0xe3c   : > { %v2089_v0 = vadd.f32 %v2348_v47, %v2081_v61  ;;  %v2582_v2 = vpop.f32.mrb[47].mxu1 }
 0xe3e   : > { %v2090_v4 = vadd.f32 %v2089_v0, %v2912_v3  ;;  %v2349_v3 = vld [vmem:[%s3280_s11] ss:$0 sm:$0xff] }
 0xe40   : > { %v2091_v6 = vsel %vm522_vm1, %v2090_v4, 0.0 }
 0xe41   : > { %2092 = vadd.xlane.f32.xlu0 %v2091_v6 }
 0xece   : > { %v2093_v7 = vpop.xlane.xlu0 %2092 }
 0xecf   : > { %v2095_v8 = vmul.f32 0.03125, %v2093_v7 }
 0xed1   : > { %v2096_v9 = vsub.f32 %v2090_v4, %v2095_v8 }
 0xed3   : > { %v2097_v10 = vmul.f32 %v2096_v9, %v2096_v9 }
 0xed5   : > { %v2098_v11 = vsel %vm522_vm1, %v2097_v10, 0.0 }
 0xed6   : > { %2099 = vadd.xlane.f32.xlu1 %v2098_v11 }
 0xf63   : > { %v2100_v35 = vpop.xlane.xlu1 %2099 }
 0xf64   : > { %v2101_v12 = vmul.f32 0.03125, %v2100_v35 }
 0xf66   : > { %v2102_v13 = vadd.f32 1e-12, %v2101_v12 }
 0xf68   : > { %2680 = vrsqrt.f32 %v2102_v13 }
 0xf72   : > { %v2681_v14 = vpop.eup %2680 }
 0xf73   : > { %v2104_v15 = vmul.f32 %v2681_v14, %v2096_v9 }
 0xf75   : > { %v2112_v17 = vmul.f32 %v2349_v3, %v2104_v15 }
 0xf77   : > { %v2120_v18 = vadd.f32 %v2350_v16, %v2112_v17 }
 0xf79   : > { %2121 = vst.msk [vmem:[%s477_s22] sm:$0xff] %vm522_vm1, %v2120_v18 }
 0xf7a   : > { %2695 = shalt.err (!%p2692_p5)
}
 0xf7b   : > { %s2696_s0 = scalar_lea.hbm %s3221_s2, 128  ;;  %s2700_s29 = scalar_lea.hbm %s3282_s13, 256 }
 0xf7c   : > { %p2697_p6 = scmp.ne.s32.totalorder %s3221_s2, %s2696_s0  ;;  %p2701_p10 = scmp.lt.u32.totalorder %s3221_s2, %s3282_s13 }
 0xf7d   : > { %p2702_p11 = scmp.lt.u32.totalorder %s2700_s29, %s2696_s0  ;;  %p2704_p13 = scmp.lt.u32.totalorder %s2696_s0, %s3221_s2 }
 0xf7e   : > { %p2698_p7 = pnand %p2697_p6, %p2875_p4 }
 0xf7f   : > { %p2703_p12 = por %p2702_p11, %p2701_p10 }
 0xf80   : > { %p2699_p9 = pneg %p2698_p7 }
 0xf81   : > { %p2705_p0 = por %p2704_p13, %p2703_p12 }
 0xf83   : > { %p2706_p1 = pnand %p2705_p0, %p2699_p9 }
 0xf85   : > { %2709 = shalt.err (!%p2706_p1)
}
 0xf86   : > { %2583 = dma.vmem_to_hbm [thread:$0]  (%p2875_p4), %s3223_s23, 128, %s3221_s2, %s2123_s14  }
 0xf87 PF: > { %p2589_p2 = scmp.ge.s32.totalorder %s2760_s30, 2  ;;  %s2149_s17 = sand.u32 1, %s2740_s25  }
 0xf88   : > { %s2150_s28 = scalar_lea.sflag [#allocation5], %s2149_s17 }
 0xf89   : > { %p2586_p3 = pnand %p2589_p2, %p2882_p8 }
 0xf8b   : > { %2735 = dma.done.wait (!%p2586_p3), %s2150_s28, 128  }
 0xf8c   : > { %2737 = vsyncadd (!%p2586_p3), %s2150_s28, 4294967168  ;;  %s26_s30 = sadd.s32 1, %s2760_s30   ;;  %s3295_s28 = sld [smem:[#allocation7_spill]] }
 0xf8d   : > { %p23_p5 = scmp.ge.s32.totalorder %s26_s30, 4   ;;  %s3296_s29 = sld [smem:[#allocation8_spill]] }
 0xf8e   : > { %s3297_s25 = smov %s2744_s26  ;;  %s3298_s26 = smov %s2748_s27 }
 0xf8f   : > { %s3299_s27 = smov %s2888_s21  ;;  %25 = sbr.rel (!%p23_p5) target bundleno = 8 (0x8), region = 151 }
 0xf96   :  { %2155 = vsyncpa [#allocation5], 1 }
 0xf97   :  { %2157 = vsyncpa [#allocation5 + $0x1], 1 }

</bundles_post_ra>
